<compile_context>
chip_gen: v7x
topology: tpu7x:2x2x1
jax: 0.10.0
libtpu: 0.0.40
codegen_flags: <defaults>
</compile_context>

<pallas_src>
import functools

import jax
import jax.numpy as jnp
from jax.experimental import pallas as pl
from jax.experimental.pallas import tpu as pltpu


# --------------------------------------------------------------------------- #
# Kernel
# --------------------------------------------------------------------------- #
def _sage_layer_kernel(a_ref, hsrc_ref, hdst_ref, ws_ref, wn_ref, b_ref,
                       out_ref, acc_ref, *, reassoc, apply_relu):
    """One SAGEConv('mean') layer, one (m, k) grid step.

    grid = (D//tm, S//tk); k (reduction over src nodes) is the last axis.
      a_ref    : [tm, tk]      bf16  row-normalized adjacency tile
      hsrc_ref : [tk, F_in]    bf16  src-node feature tile
      hdst_ref : [tm, F_in]    bf16  dst-node features (h[:D] rows for this m tile)
      ws_ref   : [F_in, F_out] bf16  self weight
      wn_ref   : [F_in, F_out] bf16  neighbour weight
      b_ref    : [1, F_out]    f32   bias
      out_ref  : [tm, F_out]
      acc_ref  : [tm, F_in] (or [tm, F_out] if reassoc) f32 accumulator scratch
    """
    k = pl.program_id(1)

    @pl.when(k == 0)
    def _init():
        acc_ref[...] = jnp.zeros_like(acc_ref)

    a = a_ref[...]
    h_src = hsrc_ref[...]
    if reassoc:
        # F_out < F_in: apply W_neigh per S-tile so only a [tk, F_out] slice is live
        # and the accumulator is F_out (not F_in) wide.
        p = jnp.dot(h_src, wn_ref[...], preferred_element_type=jnp.float32)
        acc_ref[...] += jnp.dot(a, p.astype(jnp.bfloat16),
                                preferred_element_type=jnp.float32)
    else:
        acc_ref[...] += jnp.dot(a, h_src, preferred_element_type=jnp.float32)

    @pl.when(k == pl.num_programs(1) - 1)
    def _finalize():
        h_dst = hdst_ref[...]
        out = jnp.dot(h_dst, ws_ref[...], preferred_element_type=jnp.float32)
        if reassoc:
            out = out + acc_ref[...]
        else:
            out = out + jnp.dot(acc_ref[...].astype(jnp.bfloat16), wn_ref[...],
                                preferred_element_type=jnp.float32)
        out = out + b_ref[...]
        if apply_relu:
            out = jnp.maximum(out, 0.0)
        out_ref[...] = out.astype(out_ref.dtype)


# --------------------------------------------------------------------------- #
# Per-layer pallas_call wrapper
# --------------------------------------------------------------------------- #
def _round_up(x, m):
    return ((x + m - 1) // m) * m


def _pad_to(x, rows, cols):
    return jnp.pad(x, ((0, rows - x.shape[0]), (0, cols - x.shape[1])))


def _pick_tile(dim, target, granule):
    """Largest divisor of `dim` that is <= target and a multiple of `granule`,
    falling back to the full dim (a full-extent block is always legal)."""
    if dim <= target:
        return dim
    t = (target // granule) * granule
    while t >= granule:
        if dim % t == 0:
            return t
        t -= granule
    return dim


def _sage_conv_layer(A, h_src, W_self, W_neigh, b2d, *, apply_relu, out_dtype,
                     tm_target=128, tk_target=256):
    """out = h_src[:D] @ W_self + aggregate(A, h_src, W_neigh) + b  (+ ReLU)."""
    D, S = A.shape
    assert h_src.shape[0] == S
    F_in, F_out = W_self.shape
    assert h_src.shape[1] == F_in
    reassoc = F_out < F_in

    tm = _pick_tile(D, tm_target, 16)     # second-minor granule (bf16-friendly)
    tk = _pick_tile(S, tk_target, 128)    # lane granule for A's last dim
    grid = (D // tm, S // tk)
    acc_w = F_out if reassoc else F_in

    out_item = jnp.dtype(out_dtype).itemsize
    block_bytes = (tm * tk * 2 + tk * F_in * 2 + tm * F_in * 2
                   + 2 * F_in * F_out * 2 + F_out * 4 + tm * F_out * out_item)
    scratch_bytes = tm * acc_w * 4
    # double-buffered blocks + accumulator + compiler headroom, capped well under
    # v7x's 64 MiB physical VMEM.
    vmem_limit = min(48 * 1024 * 1024,
                     2 * block_bytes + scratch_bytes + 8 * 1024 * 1024)

    if reassoc:
        flops = 2 * S * F_in * F_out + 2 * D * S * F_out + 2 * D * F_in * F_out
    else:
        flops = 2 * D * S * F_in + 4 * D * F_in * F_out
    bytes_accessed = (D * S * 2 + S * F_in * 2 + D * F_in * 2
                      + 2 * F_in * F_out * 2 + F_out * 4 + D * F_out * out_item)

    kernel = functools.partial(_sage_layer_kernel,
                               reassoc=reassoc, apply_relu=apply_relu)
    grid_spec = pltpu.PrefetchScalarGridSpec(
        num_scalar_prefetch=0,
        grid=grid,
        in_specs=[
            pl.BlockSpec((tm, tk), lambda i, k: (i, k)),        # A tile
            pl.BlockSpec((tk, F_in), lambda i, k: (k, 0)),      # src features
            pl.BlockSpec((tm, F_in), lambda i, k: (i, 0)),      # dst features (h[:D])
            pl.BlockSpec((F_in, F_out), lambda i, k: (0, 0)),   # W_self
            pl.BlockSpec((F_in, F_out), lambda i, k: (0, 0)),   # W_neigh
            pl.BlockSpec((1, F_out), lambda i, k: (0, 0)),      # bias
        ],
        out_specs=pl.BlockSpec((tm, F_out), lambda i, k: (i, 0)),
        scratch_shapes=[pltpu.VMEM((tm, acc_w), jnp.float32)],
    )
    return pl.pallas_call(
        kernel,
        out_shape=jax.ShapeDtypeStruct((D, F_out), out_dtype),
        grid_spec=grid_spec,
        compiler_params=pltpu.CompilerParams(
            dimension_semantics=("parallel", "arbitrary"),
            vmem_limit_bytes=int(vmem_limit)),
        cost_estimate=pl.CostEstimate(flops=int(flops), transcendentals=0,
                                      bytes_accessed=int(bytes_accessed)),
    )(A, h_src, h_src, W_self, W_neigh, b2d)


# --------------------------------------------------------------------------- #
# One-time parameter / input preparation (hoisted out of the forward)
# --------------------------------------------------------------------------- #
def prepare_sage_params(params):
    """Pad feature dims to 128-lane multiples, cast matmul weights to bf16,
    keep biases in f32 as [1, F_out_pad] rows. Done once per model."""
    prepared = []
    for W_self, W_neigh, b in params:
        F_in, F_out = W_self.shape
        F_in_p, F_out_p = _round_up(F_in, 128), _round_up(F_out, 128)
        Ws = _pad_to(W_self, F_in_p, F_out_p).astype(jnp.bfloat16)
        Wn = _pad_to(W_neigh, F_in_p, F_out_p).astype(jnp.bfloat16)
        b2d = _pad_to(b.reshape(1, F_out), 1, F_out_p).astype(jnp.float32)
        prepared.append((Ws, Wn, b2d))
    return prepared


def prepare_blocks(blocks):
    """Cast dense row-normalized block adjacencies to bf16 MXU operands once."""
    return [A.astype(jnp.bfloat16) for A in blocks]


def prepare_features(h, f_in_padded):
    """Zero-pad layer-0 feature dim to the padded F_in and cast to bf16."""
    return _pad_to(h, h.shape[0], f_in_padded).astype(jnp.bfloat16)


# --------------------------------------------------------------------------- #
# Full forward (mirror of SAGE.forward's conv stack, any n_layers >= 1)
# --------------------------------------------------------------------------- #
def sage_only_forward(blocks_bf16, h0_bf16, prepared_params):
    """Returns lane-padded logits [D_last, round_up(n_classes, 128)] in f32;
    callers slice off the real class columns."""
    n_layers = len(prepared_params)
    # PyTorch module: for n_layers == 1 the activation IS applied after the conv;
    # for n_layers > 1 it is applied after every conv except the last.
    apply_relu_last = (n_layers == 1)
    h = h0_bf16
    for l, (A, (Ws, Wn, b2d)) in enumerate(zip(blocks_bf16, prepared_params)):
        is_last = (l == n_layers - 1)
        h = _sage_conv_layer(
            A, h, Ws, Wn, b2d,
            apply_relu=(not is_last) or apply_relu_last,
            out_dtype=jnp.float32 if is_last else jnp.bfloat16)
        # dropout = identity (eval)
    return h


# --------------------------------------------------------------------------- #
# Test helpers + demo
# --------------------------------------------------------------------------- #
def _make_block_adj(key, num_dst, num_src):
    """Random bipartite block adjacency, row-normalized for 'mean' aggregation."""
    raw = jax.random.bernoulli(key, p=0.3, shape=(num_dst, num_src)).astype(jnp.float32)
    # guarantee at least one neighbor per dst node (dst i is src i in a DGL block)
    eye = jnp.zeros((num_dst, num_src)).at[jnp.arange(num_dst), jnp.arange(num_dst)].set(1.0)
    adj = jnp.maximum(raw, eye)
    deg = jnp.sum(adj, axis=1, keepdims=True)
    return adj / deg


def _init_params(key, dims):
    """dims = [in_feats, n_hidden, ..., n_classes]; deterministic init."""
    params = []
    for i in range(len(dims) - 1):
        f_in, f_out = dims[i], dims[i + 1]
        k1, k2, key = jax.random.split(key, 3)
        scale = 1.0 / jnp.sqrt(jnp.float32(f_in))
        W_self = jax.random.uniform(k1, (f_in, f_out), jnp.float32, -scale, scale)
        W_neigh = jax.random.uniform(k2, (f_in, f_out), jnp.float32, -scale, scale)
        b = jnp.zeros((f_out,), jnp.float32)
        params.append((W_self, W_neigh, b))
    return params


if __name__ == "__main__":
    # small 2-layer GraphSAGE config (big enough to exercise a multi-step grid
    # and both the stacked and reassociated layer paths)
    num_nodes = 1024
    in_feats, n_hidden, n_classes = 16, 256, 8
    num_src0, num_dst0 = 512, 256     # block 0: 512 src -> 256 dst
    num_src1, num_dst1 = 256, 128     # block 1: 256 src -> 128 dst

    key = jax.random.PRNGKey(0)
    k_e, k_i, k_a0, k_a1, k_p = jax.random.split(key, 5)

    # embedding layer (nn.Embedding equivalent): plain-JAX gather outside the kernel
    emb_table = jax.random.normal(k_e, (num_nodes, in_feats), jnp.float32)
    input_nodes = jax.random.randint(k_i, (num_src0,), 0, num_nodes)
    h0 = jnp.take(emb_table, input_nodes, axis=0)

    blocks_f32 = [
        _make_block_adj(k_a0, num_dst0, num_src0),
        _make_block_adj(k_a1, num_dst1, num_src1),
    ]
    params_f32 = _init_params(k_p, [in_feats, n_hidden, n_classes])

    # one-time prep (hoisted out of the serving loop)
    blocks = prepare_blocks(blocks_f32)
    prepared = prepare_sage_params(params_f32)
    h0_p = prepare_features(h0, prepared[0][0].shape[0])

    out_padded = sage_only_forward(blocks, h0_p, prepared)
    out_padded = jax.block_until_ready(out_padded)
    out = out_padded[:, :n_classes]
    assert out.shape == (num_dst1, n_classes), out.shape

    # plain-JAX f32 reference (canonical, non-reassociated formulation)
    href = h0
    for l, (A, (Ws, Wn, b)) in enumerate(zip(blocks_f32, params_f32)):
        hd = href[:A.shape[0]]
        href = hd @ Ws + (A @ href) @ Wn + b
        if l != len(params_f32) - 1:
            href = jnp.maximum(href, 0.0)
    max_err = float(jnp.max(jnp.abs(out - href)))
    assert jnp.allclose(out, href, atol=5e-2, rtol=5e-2), max_err

    print("KERNEL_OK")
</pallas_src>

<mosaic_0001>
module attributes {stable_mosaic.version = 11 : i64} {
  func.func @_sage_layer_kernel(%arg0: i32, %arg1: i32, %arg2: memref<128x256xbf16, #tpu.memory_space<vmem>>, %arg3: memref<256x128xbf16, #tpu.memory_space<vmem>>, %arg4: memref<128x128xbf16, #tpu.memory_space<vmem>>, %arg5: memref<128x256xbf16, #tpu.memory_space<vmem>>, %arg6: memref<128x256xbf16, #tpu.memory_space<vmem>>, %arg7: memref<1x256xf32, #tpu.memory_space<vmem>>, %arg8: memref<128x256xbf16, #tpu.memory_space<vmem>>, %arg9: memref<128x128xf32, #tpu.memory_space<vmem>>) attributes {dimension_semantics = [#tpu.dimension_semantics<parallel>, #tpu.dimension_semantics<arbitrary>], iteration_bounds = array<i64: 2, 2>, scalar_prefetch = 0 : i64, scratch_operands = 1 : i64, tpu.core_type = #tpu.core_type<tc>, window_params = [{transform_indices = @transform_0, window_bounds = array<i64: 128, 256>}, {transform_indices = @transform_1, window_bounds = array<i64: 256, 128>}, {transform_indices = @transform_2, window_bounds = array<i64: 128, 128>}, {pipeline_mode = #tpu.pipeline_mode<synchronous>, transform_indices = @transform_3, window_bounds = array<i64: 128, 256>}, {pipeline_mode = #tpu.pipeline_mode<synchronous>, transform_indices = @transform_4, window_bounds = array<i64: 128, 256>}, {pipeline_mode = #tpu.pipeline_mode<synchronous>, transform_indices = @transform_5, window_bounds = array<i64: 1, 256>}, {transform_indices = @transform_6, window_bounds = array<i64: 128, 256>}]} {
    %c0_i32 = arith.constant 0 : i32
    %0 = arith.cmpi eq, %arg1, %c0_i32 : i32
    %1 = arith.extui %0 : i1 to i32
    %c0_i32_0 = arith.constant 0 : i32
    %2 = arith.cmpi ne, %1, %c0_i32_0 : i32
    scf.if %2 {
      %cst_9 = arith.constant 0.000000e+00 : f32
      %12 = vector.broadcast %cst_9 : f32 to vector<128x128xf32>
      %c0_10 = arith.constant 0 : index
      %c0_11 = arith.constant 0 : index
      %13 = vector.load %arg9[%c0_10, %c0_11] : memref<128x128xf32, #tpu.memory_space<vmem>>, vector<128x128xf32>
      tpu.vector_store %arg9[%c0_10, %c0_11], %12 {strides = array<i32>} : memref<128x128xf32, #tpu.memory_space<vmem>>, vector<128x128xf32>,
    } else {
    }
    %c0 = arith.constant 0 : index
    %c0_1 = arith.constant 0 : index
    %3 = vector.load %arg2[%c0, %c0_1] : memref<128x256xbf16, #tpu.memory_space<vmem>>, vector<128x256xbf16>
    %c0_2 = arith.constant 0 : index
    %c0_3 = arith.constant 0 : index
    %4 = vector.load %arg3[%c0_2, %c0_3] : memref<256x128xbf16, #tpu.memory_space<vmem>>, vector<256x128xbf16>
    %c0_4 = arith.constant 0 : index
    %c0_5 = arith.constant 0 : index
    %5 = vector.load %arg9[%c0_4, %c0_5] : memref<128x128xf32, #tpu.memory_space<vmem>>, vector<128x128xf32>
    %cst = arith.constant dense<0.000000e+00> : vector<128x128xf32>
    %6 = tpu.matmul %3, %4, %cst {dimension_numbers = #tpu.dot_dimension_numbers<[1], [0], [0], [1], [0, 0, 1, 1], [], []>} : vector<128x256xbf16>, vector<256x128xbf16>, vector<128x128xf32> -> vector<128x128xf32>
    %7 = arith.addf %5, %6 : vector<128x128xf32>
    %c0_6 = arith.constant 0 : index
    %c0_7 = arith.constant 0 : index
    %8 = vector.load %arg9[%c0_6, %c0_7] : memref<128x128xf32, #tpu.memory_space<vmem>>, vector<128x128xf32>
    tpu.vector_store %arg9[%c0_6, %c0_7], %7 {strides = array<i32>} : memref<128x128xf32, #tpu.memory_space<vmem>>, vector<128x128xf32>,
    %c1_i32 = arith.constant 1 : i32
    %9 = arith.cmpi eq, %arg1, %c1_i32 : i32
    %10 = arith.extui %9 : i1 to i32
    %c0_i32_8 = arith.constant 0 : i32
    %11 = arith.cmpi ne, %10, %c0_i32_8 : i32
    scf.if %11 {
      %c0_9 = arith.constant 0 : index
      %c0_10 = arith.constant 0 : index
      %12 = vector.load %arg4[%c0_9, %c0_10] : memref<128x128xbf16, #tpu.memory_space<vmem>>, vector<128x128xbf16>
      %c0_11 = arith.constant 0 : index
      %c0_12 = arith.constant 0 : index
      %13 = vector.load %arg5[%c0_11, %c0_12] : memref<128x256xbf16, #tpu.memory_space<vmem>>, vector<128x256xbf16>
      %cst_13 = arith.constant dense<0.000000e+00> : vector<128x256xf32>
      %14 = tpu.matmul %12, %13, %cst_13 {dimension_numbers = #tpu.dot_dimension_numbers<[1], [0], [0], [1], [0, 0, 1, 1], [], []>} : vector<128x128xbf16>, vector<128x256xbf16>, vector<128x256xf32> -> vector<128x256xf32>
      %c0_14 = arith.constant 0 : index
      %c0_15 = arith.constant 0 : index
      %15 = vector.load %arg9[%c0_14, %c0_15] : memref<128x128xf32, #tpu.memory_space<vmem>>, vector<128x128xf32>
      %16 = arith.truncf %15 : vector<128x128xf32> to vector<128x128xbf16>
      %c0_16 = arith.constant 0 : index
      %c0_17 = arith.constant 0 : index
      %17 = vector.load %arg6[%c0_16, %c0_17] : memref<128x256xbf16, #tpu.memory_space<vmem>>, vector<128x256xbf16>
      %cst_18 = arith.constant dense<0.000000e+00> : vector<128x256xf32>
      %18 = tpu.matmul %16, %17, %cst_18 {dimension_numbers = #tpu.dot_dimension_numbers<[1], [0], [0], [1], [0, 0, 1, 1], [], []>} : vector<128x128xbf16>, vector<128x256xbf16>, vector<128x256xf32> -> vector<128x256xf32>
      %19 = arith.addf %14, %18 : vector<128x256xf32>
      %c0_19 = arith.constant 0 : index
      %c0_20 = arith.constant 0 : index
      %20 = vector.load %arg7[%c0_19, %c0_20] : memref<1x256xf32, #tpu.memory_space<vmem>>, vector<1x256xf32>
      %21 = vector.broadcast %20 : vector<1x256xf32> to vector<128x256xf32>
      %22 = arith.addf %19, %21 : vector<128x256xf32>
      %cst_21 = arith.constant 0.000000e+00 : f32
      %23 = vector.broadcast %cst_21 : f32 to vector<128x256xf32>
      %24 = arith.maximumf %22, %23 : vector<128x256xf32>
      %25 = arith.truncf %24 : vector<128x256xf32> to vector<128x256xbf16>
      %c0_22 = arith.constant 0 : index
      %c0_23 = arith.constant 0 : index
      %26 = vector.load %arg8[%c0_22, %c0_23] : memref<128x256xbf16, #tpu.memory_space<vmem>>, vector<128x256xbf16>
      tpu.vector_store %arg8[%c0_22, %c0_23], %25 {strides = array<i32>} : memref<128x256xbf16, #tpu.memory_space<vmem>>, vector<128x256xbf16>,
    } else {
    }
    return
  }
  func.func @transform_0(%arg0: i32, %arg1: i32) -> (i32, i32) {
    %c0_i32 = arith.constant 0 : i32
    return %arg0, %arg1 : i32, i32
  }
  func.func @transform_1(%arg0: i32, %arg1: i32) -> (i32, i32) {
    %c0_i32 = arith.constant 0 : i32
    %c0_i32_0 = arith.constant 0 : i32
    return %arg1, %c0_i32 : i32, i32
  }
  func.func @transform_2(%arg0: i32, %arg1: i32) -> (i32, i32) {
    %c0_i32 = arith.constant 0 : i32
    %c0_i32_0 = arith.constant 0 : i32
    return %arg0, %c0_i32 : i32, i32
  }
  func.func @transform_3(%arg0: i32, %arg1: i32) -> (i32, i32) {
    %c0_i32 = arith.constant 0 : i32
    %c0_i32_0 = arith.constant 0 : i32
    %c0_i32_1 = arith.constant 0 : i32
    return %c0_i32, %c0_i32_0 : i32, i32
  }
  func.func @transform_4(%arg0: i32, %arg1: i32) -> (i32, i32) {
    %c0_i32 = arith.constant 0 : i32
    %c0_i32_0 = arith.constant 0 : i32
    %c0_i32_1 = arith.constant 0 : i32
    return %c0_i32, %c0_i32_0 : i32, i32
  }
  func.func @transform_5(%arg0: i32, %arg1: i32) -> (i32, i32) {
    %c0_i32 = arith.constant 0 : i32
    %c0_i32_0 = arith.constant 0 : i32
    %c0_i32_1 = arith.constant 0 : i32
    return %c0_i32, %c0_i32_0 : i32, i32
  }
  func.func @transform_6(%arg0: i32, %arg1: i32) -> (i32, i32) {
    %c0_i32 = arith.constant 0 : i32
    %c0_i32_0 = arith.constant 0 : i32
    return %arg0, %c0_i32 : i32, i32
  }
}

</mosaic_0001>

<bundles_post_ra>
// kernel: tpu_custom_call.1
= control target key start
LH: loop header
LB: loop body
LE: loop exit
PB: predicated region body
PF: predicated region fallthrough
CT: control target
= control target key end

     0   :  { %s3117_s0 = inlined_call_operand.hbm [shape: bf16[256,512], index: 0, kind: input, shape index: {}]   ;;  %s3118_s1 = inlined_call_operand.hbm [shape: bf16[512,128], index: 1, kind: input, shape index: {}]   ;;  %s3119_s2 = inlined_call_operand.hbm [shape: bf16[512,128], index: 2, kind: input, shape index: {}]   ;;  %s3120_s3 = inlined_call_operand.hbm [shape: bf16[128,256], index: 3, kind: input, shape index: {}]   ;;  %s3121_s4 = inlined_call_operand.hbm [shape: bf16[128,256], index: 4, kind: input, shape index: {}]   ;;  %s3122_s5 = inlined_call_operand.vmem [shape: f32[1,256], index: 5, kind: input, shape index: {}]   ;;  %s3123_s6 = inlined_call_operand.hbm [shape: bf16[256,256], index: 6, kind: output, shape index: {}]  }
   0x1   :  { %3145 = sst [smem:[#allocation26_spill]] %s3118_s1 }
   0x2   :  { %3146 = sst [smem:[#allocation27_spill]] %s3120_s3 }
   0x3   :  { %3147 = sst [smem:[#allocation28_spill]] %s3122_s5 }
   0x4   :  { %3148 = sst [smem:[#allocation29_spill]] %s3123_s6 }
   0x5   :  { %11 = vsyncpa [#allocation4], 0 }
   0x6   :  { %13 = vsyncpa [#allocation4 + $0x1], 0 }
   0x7   :  { %14 = vsyncpa [#allocation7], 0 }
   0x8   :  { %16 = vsyncpa [#allocation7 + $0x1], 0 }
   0x9   :  { %17 = vsyncpa [#allocation10], 0 }
   0xa   :  { %18 = vsyncpa [#allocation5], 0 }
   0xb   :  { %20 = vsyncpa [#allocation5 + $0x1], 0  ;;  %s2521_s21 = smov 0   ;;  %s2523_s22 = smov 0  }
   0xc   :  { %s2525_s23 = smov 0   ;;  %s2527_s24 = smov 0  }
   0xd   :  { %s2529_s25 = smov 0   ;;  %s2531_s26 = smov 0  }
   0xe   :  { %s2533_s27 = smov 0   ;;  %s2535_s28 = smov 0  }
   0xf   :  { %s2537_s29 = smov 0   ;;  %s2539_s30 = smov 0  }
  0x10   :  { %s2541_s7 = smov 0   ;;  %s2543_s8 = smov 0  }
  0x11   :  { %s2545_s9 = smov 0   ;;  %s2547_s10 = smov 0  }
  0x12 LB: > { %3149 = sst [smem:[#allocation18_spill]] %s2433_s25  ;;  %s2592_s11 = sadd.s32 4294967295, %s2469_s10   ;;  %s2469_s10 = sphi %s2547_s10, %s26_s10   ;;  %s2465_s9 = sphi %s2545_s9, %s3216_s9   ;;  %s2461_s8 = sphi %s2543_s8, %s3215_s8   ;;  %s2457_s7 = sphi %s2541_s7, %s3214_s7   ;;  %s2453_s30 = sphi %s2539_s30, %s3213_s30   ;;  %s2449_s29 = sphi %s2537_s29, %s3212_s29   ;;  %s2445_s28 = sphi %s2535_s28, %s3211_s28   ;;  %s2441_s27 = sphi %s2533_s27, %s3210_s27   ;;  %s2437_s26 = sphi %s2531_s26, %s3204_s26   ;;  %s2433_s25 = sphi %s2529_s25, %s3203_s25   ;;  %s2429_s24 = sphi %s2527_s24, %s3202_s24   ;;  %s2425_s23 = sphi %s2525_s23, %s3209_s23   ;;  %s2421_s22 = sphi %s2523_s22, %s3208_s22   ;;  %s2417_s21 = sphi %s2521_s21, %s3207_s21  }
  0x13   : > { %3150 = sst [smem:[#allocation19_spill]] %s2437_s26  ;;  %p1652_p0 = scmp.ge.s32.totalorder %s2469_s10, 1 }
  0x14   : > { %3151 = sst [smem:[#allocation20_spill]] %s2453_s30  ;;  %p3125_p1 = scmp.eq.s32.totalorder %s2592_s11, 0 }
  0x15   : > { %3152 = sst [smem:[#allocation21_spill]] %s2457_s7  ;;  %p212_p3 = scmp.lt.s32.totalorder %s2469_s10, 5 }
  0x16   : > { %s2471_s13 = smov [#allocation9]   ;;  %s3155_s3 = sld [smem:[#allocation27_spill]] }
  0x17   : > { %p2598_p4 = pnand %p1652_p0, %p212_p3  ;;  %s224_s14 = sshll.u32 %s2471_s13, 4  ;;  %s225_s14 = int_to_ptr.vmem [resolvable:$true] %s224_s14 }
  0x19   : > { %s3153_s12 = scalar_select %p2598_p4, 1, 0 }
  0x1a   : > { %p1919_p5 = pneg %p2598_p4 }
  0x1c   : > { %p2606_p6 = pnand %p1919_p5, %p3125_p1  ;;  %s2165_s18 = scalar_lea.hbm %s3155_s3, 2048 }
  0x1d   : > { %p2166_p7 = scmp.ne.s32.totalorder %s3155_s3, %s2165_s18  ;;  %p2172_p11 = scmp.lt.u32.totalorder %s2165_s18, %s3155_s3 }
  0x1e   : > { %p3137_p8 = pneg %p2606_p6 }
  0x20   : > { %p2168_p9 = pnand %p3137_p8, %p2166_p7 }
  0x22   : > { %p2169_p10 = pneg %p2168_p9 }
  0x24   : > { %p2174_p12 = pnand %p2172_p11, %p2169_p10 }
  0x26   : > { %2177 = shalt.err (!%p2174_p12)
}
  0x27   : > { %s2178_s16 = scalar_lea.vmem %s225_s14, 2048  ;;  %p2186_p5 = scmp.lt.s32.totalorder %s225_s14, %s225_s14 }
  0x28   : > { %p2179_p13 = scmp.ne.s32.totalorder %s225_s14, %s2178_s16  ;;  %p2187_p2 = scmp.lt.s32.totalorder %s2178_s16, %s2178_s16 }
  0x2a   : > { %p2181_p0 = pnand %p2179_p13, %p3137_p8  ;;  %p2188_p1 = por %p2187_p2, %p2186_p5 }
  0x2c   : > { %p2182_p3 = pneg %p2181_p0 }
  0x2e   : > { %p2189_p4 = pnand %p2188_p1, %p2182_p3 }
  0x30   : > { %2192 = shalt.err (!%p2189_p4)
}
  0x31   : > { %s3127_s17 = smov 128   ;;  %s3129_s6 = smov 8  }
  0x32   : > { %1922 = dma.hbm_to_vmem [thread:$0]  (!%p2606_p6), %s3155_s3, 2048, %s225_s14, [#allocation10], %s3127_s17, %s3127_s17, %s3129_s6  }
  0x33   : > { %s35_s20 = sadd.s32 1, %s2461_s8  ;;  %s38_s13 = sadd.s32 1, %s2465_s9 }
  0x34   : > { %p36_p1 = scmp.ge.s32.totalorder %s35_s20, 2  ;;  %p3136_p2 = scmp.eq.s32.totalorder %s2469_s10, 0 }
  0x35   : > { %s73_s16 = sadd.s32 1, %s2437_s26  ;;  %p80_p4 = scmp.ne.s32.totalorder %s2437_s26, %s2433_s25 }
  0x36   : > { %s3218_s20 = smov (%p36_p1, %s35_s20), 0  ;;  %s3220_s13 = smov (!%p36_p1, %s38_s13), %s2465_s9 }
  0x37   : > { %3156 = sst [smem:[#allocation22_spill]] %s3218_s20  ;;  %s43_s7 = ssub.s32 %s2461_s8, %s3218_s20 }
  0x38   : > { %p2648_p7 = por %p80_p4, %p3136_p2  ;;  %p40_p9 = scmp.ge.s32.totalorder %s3220_s13, 2 }
  0x39   : > { %p71_p10 = scmp.eq.s32.totalorder %s43_s7, 0  ;;  %p86_p11 = scmp.ne.s32.totalorder %s2433_s25, %s2429_s24 }
  0x3a   : > { %p3135_p12 = scmp.lt.s32.totalorder %s2469_s10, 4  ;;  %s3222_s13 = smov (%p40_p9, %s3220_s13), 0 }
  0x3b   : > { %3158 = sst [smem:[#allocation23_spill]] %s3222_s13  ;;  %s2662_s19 = ssub.s32 %s2465_s9, %s3222_s13 }
  0x3c   : > { %s2658_s18 = scalar_select %p71_p10, %s2437_s26, %s73_s16  }
  0x3d   : > { %p3160_p13 = scmp.eq.s32.totalorder %s2592_s11, 0  ;;  %s44_s6 = sor.u32 %s43_s7, %s2662_s19 }
  0x3e   : > { %3159 = sst [smem:[#allocation24_spill]] %s2658_s18  ;;  %p2672_p5 = scmp.eq.s32.totalorder %s44_s6, 0 }
  0x3f   : > { %p2666_p0 = por %p86_p11, %p3160_p13  ;;  %s278_s3 = sand.u32 1, %s2469_s10  }
  0x40   : > { %s3163_s24 = scalar_select %p2672_p5, 1, 0 }
  0x41   : > { %s3161_s17 = scalar_select %p2666_p0, 1, 0 }
  0x42   : > { %s280_s20 = sand.u32 1, %s2437_s26   ;;  %s1771_s16 = sshll.u32 %s2461_s8, 11 }
  0x43   : > { %3162 = sst [smem:[#allocation25_spill]] %s3161_s17  ;;  %s1661_s5 = sshll.u32 %s280_s20, 7 }
  0x44   : > { %s3164_s1 = sld [smem:[#allocation26_spill]]  ;;  %s282_s17 = scalar_lea.vmem [#allocation6], %s1661_s5 }
  0x45   : > { %s289_s7 = sshll.u32 %s282_s17, 4  ;;  %p2688_p1 = pnand %p3135_p12, %p2648_p7  ;;  %s2692_s7 = int_to_ptr.vmem [resolvable:$true] %s289_s7 }
  0x46   : > { %s2694_s20 = scalar_lea.sflag [#allocation7], %s278_s3 }
  0x47   : > { %p2195_p9 = pneg %p2688_p1 }
  0x4a   : > { %s2682_s30 = scalar_lea.hbm %s3164_s1, %s1771_s16  ;;  %s2198_s14 = scalar_lea.hbm %s3164_s1, 4096 }
  0x4b   : > { %s2193_s13 = scalar_lea.hbm %s2682_s30, 2048  ;;  %p2199_p7 = scmp.lt.u32.totalorder %s2682_s30, %s3164_s1 }
  0x4c   : > { %p2194_p4 = scmp.ne.s32.totalorder %s2682_s30, %s2193_s13  ;;  %p2200_p13 = scmp.lt.u32.totalorder %s2198_s14, %s2193_s13 }
  0x4d   : > { %p2202_p12 = scmp.lt.u32.totalorder %s2193_s13, %s2682_s30 }
  0x4e   : > { %p2196_p10 = pnand %p2195_p9, %p2194_p4  ;;  %p2201_p3 = por %p2200_p13, %p2199_p7 }
  0x50   : > { %p2197_p11 = pneg %p2196_p10  ;;  %p2203_p2 = por %p2202_p12, %p2201_p3 }
  0x52   : > { %p2204_p8 = pnand %p2203_p2, %p2197_p11 }
  0x54   : > { %2207 = shalt.err (!%p2204_p8)
}
  0x55   : > { %s2208_s3 = scalar_lea.vmem %s2692_s7, 2048  ;;  %s2474_s5 = smov [#allocation6]  }
  0x56   : > { %p2209_p4 = scmp.ne.s32.totalorder %s2692_s7, %s2208_s3  ;;  %s2213_s17 = sshll.u32 %s2474_s5, 4  ;;  %s2214_s17 = int_to_ptr.vmem [resolvable:$false] %s2213_s17 }
  0x57   : > { %s2215_s18 = scalar_lea.vmem %s2214_s17, 4096  ;;  %p2216_p5 = scmp.lt.s32.totalorder %s2692_s7, %s2214_s17 }
  0x58   : > { %p2211_p10 = pnand %p2209_p4, %p2195_p9  ;;  %p2217_p7 = scmp.lt.s32.totalorder %s2215_s18, %s2208_s3 }
  0x5a   : > { %p2212_p0 = pneg %p2211_p10  ;;  %p2218_p13 = por %p2217_p7, %p2216_p5 }
  0x5c   : > { %p2219_p12 = pnand %p2218_p13, %p2212_p0 }
  0x5e   : > { %2222 = shalt.err (!%p2219_p12)
}
  0x5f   : > { %s3141_s13 = smov 64   ;;  %s3142_s14 = smov 4  }
  0x60   : > { %1932 = dma.hbm_to_vmem [thread:$0]  (!%p2688_p1), %s2682_s30, 2048, %s2692_s7, %s2694_s20, %s3141_s13, %s3141_s13, %s3142_s14  }
  0x61   : > { %s2477_s16 = smov [#allocation11]   ;;  %s2223_s18 = scalar_lea.hbm %s3121_s4, 2048 }
  0x62   : > { %s237_s5 = sshll.u32 %s2477_s16, 4  ;;  %p2224_p8 = scmp.ne.s32.totalorder %s3121_s4, %s2223_s18  ;;  %s238_s5 = int_to_ptr.vmem [resolvable:$true] %s237_s5 }
  0x63   : > { %p3166_p2 = pneg %p2606_p6  ;;  %p2230_p5 = scmp.lt.u32.totalorder %s2223_s18, %s3121_s4 }
  0x65   : > { %p2226_p0 = pnand %p2224_p8, %p3166_p2 }
  0x67   : > { %p2227_p3 = pneg %p2226_p0 }
  0x69   : > { %p2232_p1 = pnand %p2230_p5, %p2227_p3 }
  0x6b   : > { %2235 = shalt.err (!%p2232_p1)
}
  0x6c   : > { %s2236_s30 = scalar_lea.vmem %s238_s5, 2048  ;;  %p3167_p11 = pmov %p3166_p2 }
  0x6d   : > { %p2237_p9 = scmp.ne.s32.totalorder %s238_s5, %s2236_s30  ;;  %p2244_p7 = scmp.lt.s32.totalorder %s238_s5, %s238_s5 }
  0x6e   : > { %p2245_p13 = scmp.lt.s32.totalorder %s2236_s30, %s2236_s30 }
  0x6f   : > { %p2239_p4 = pnand %p2237_p9, %p3167_p11 }
  0x70   : > { %p2246_p12 = por %p2245_p13, %p2244_p7 }
  0x71   : > { %p2240_p10 = pneg %p2239_p4 }
  0x73   : > { %p2247_p2 = pnand %p2246_p12, %p2240_p10 }
  0x75   : > { %2250 = shalt.err (!%p2247_p2)
}
  0x76   : > { %s3168_s1 = smov 8   ;;  %s3169_s26 = smov 128  }
  0x77   : > { %1925 = dma.hbm_to_vmem [thread:$0]  (!%p2606_p6), %s3121_s4, 2048, %s238_s5, [#allocation10], %s3169_s26, %s3169_s26, %s3168_s1  }
  0x78   : > { %s47_s15 = sadd.s32 1, %s2449_s29  ;;  %p3170_p8 = scmp.ne.s32.totalorder %s3163_s24, 0 }
  0x79   : > { %p54_p0 = scmp.ne.s32.totalorder %s2449_s29, %s2445_s28  ;;  %p60_p3 = scmp.ne.s32.totalorder %s2445_s28, %s2441_s27 }
  0x7a   : > { %s2752_s16 = scalar_select %p3170_p8, %s2449_s29, %s47_s15  }
  0x7b   : > { %s254_s17 = sand.u32 1, %s2449_s29   ;;  %s1658_s3 = sshll.u32 %s2461_s8, 1 }
  0x7c   : > { %p3171_p5 = scmp.eq.s32.totalorder %s2469_s10, 0  ;;  %p3172_p9 = scmp.eq.s32.totalorder %s2592_s11, 0 }
  0x7d   : > { %s1656_s6 = sshll.u32 %s254_s17, 7  ;;  %s1770_s30 = sshll.u32 %s2465_s9, 6 }
  0x7e   : > { %p56_p1 = por %p3171_p5, %p54_p0  ;;  %p2764_p11 = por %p3172_p9, %p60_p3 }
  0x7f   : > { %s265_s25 = sadd.s32 %s1770_s30, %s1658_s3  ;;  %s258_s5 = scalar_lea.vmem [#allocation3], %s1656_s6 }
  0x80   : > { %s268_s7 = sshll.u32 %s258_s5, 4  ;;  %s1660_s24 = sshll.u32 %s265_s25, 6  ;;  %s2769_s7 = int_to_ptr.vmem [resolvable:$true] %s268_s7 }
  0x81   : > { %s2774_s27 = scalar_lea.hbm %s3117_s0, %s1660_s24  ;;  %p3174_p6 = scmp.lt.s32.totalorder %s2469_s10, 4 }
  0x82   : > { %s2782_s3 = scalar_lea.sflag [#allocation4], %s254_s17  ;;  %s2251_s6 = scalar_lea.hbm %s2774_s27, 2048 }
  0x83   : > { %p2778_p4 = pnand %p3174_p6, %p56_p1  ;;  %p2252_p10 = scmp.ne.s32.totalorder %s2774_s27, %s2251_s6 }
  0x84   : > { %s2256_s25 = scalar_lea.hbm %s3117_s0, 8192  ;;  %p2257_p2 = scmp.lt.u32.totalorder %s2774_s27, %s3117_s0 }
  0x85   : > { %p2253_p7 = pneg %p2778_p4  ;;  %p2258_p8 = scmp.lt.u32.totalorder %s2256_s25, %s2251_s6 }
  0x86   : > { %p2260_p3 = scmp.lt.u32.totalorder %s2251_s6, %s2774_s27 }
  0x87   : > { %p2254_p13 = pnand %p2253_p7, %p2252_p10  ;;  %p2259_p0 = por %p2258_p8, %p2257_p2 }
  0x89   : > { %p2255_p12 = pneg %p2254_p13  ;;  %p2261_p5 = por %p2260_p3, %p2259_p0 }
  0x8b   : > { %p2262_p1 = pnand %p2261_p5, %p2255_p12 }
  0x8d   : > { %2265 = shalt.err (!%p2262_p1)
}
  0x8e   : > { %s2266_s17 = scalar_lea.vmem %s2769_s7, 2048  ;;  %s2478_s15 = smov [#allocation3]  }
  0x8f   : > { %p2267_p9 = scmp.ne.s32.totalorder %s2769_s7, %s2266_s17  ;;  %s2271_s13 = sshll.u32 %s2478_s15, 4  ;;  %s2272_s13 = int_to_ptr.vmem [resolvable:$false] %s2271_s13 }
  0x90   : > { %s2273_s30 = scalar_lea.vmem %s2272_s13, 4096  ;;  %p2274_p13 = scmp.lt.s32.totalorder %s2769_s7, %s2272_s13 }
  0x91   : > { %p2269_p6 = pnand %p2267_p9, %p2253_p7  ;;  %p2275_p2 = scmp.lt.s32.totalorder %s2273_s30, %s2266_s17 }
  0x93   : > { %p2270_p10 = pneg %p2269_p6  ;;  %p2276_p8 = por %p2275_p2, %p2274_p13 }
  0x95   : > { %p2277_p0 = pnand %p2276_p8, %p2270_p10 }
  0x97   : > { %2280 = shalt.err (!%p2277_p0)
}
  0x98   : > { %s2479_s6 = smov 256   ;;  %s1651_s14 = sadd.s32 4294967294, %s2469_s10  }
  0x99   : > { %1929 = dma.hbm_to_vmem [thread:$0]  (!%p2778_p4), %s2774_s27, 2048, %s2769_s7, %s2782_s3, %s2479_s6, %s3169_s26, %s3168_s1  }
  0x9a   : > { %s99_s25 = sadd.s32 1, %s2425_s23  ;;  %p3176_p7 = scmp.eq.s32.totalorder %s2662_s19, 0 }
  0x9b   : > { %p106_p12 = scmp.ne.s32.totalorder %s2425_s23, %s2421_s22  ;;  %p112_p3 = scmp.ne.s32.totalorder %s2421_s22, %s2417_s21 }
  0x9c   : > { %s2817_s5 = scalar_select %p3176_p7, %s2425_s23, %s99_s25  }
  0x9d   : > { %p205_p5 = scmp.eq.s32.totalorder %s1651_s14, 3  ;;  %s301_s24 = sand.u32 1, %s2425_s23  }
  0x9e   : > { %p3177_p1 = scmp.eq.s32.totalorder %s2469_s10, 0  ;;  %p3178_p6 = scmp.eq.s32.totalorder %s2592_s11, 0 }
  0x9f   : > { %p3180_p13 = scmp.eq.s32.totalorder %s2592_s11, 3  ;;  %p2838_p4 = por %p205_p5, %p112_p3 }
  0xa0   : > { %p108_p9 = por %p106_p12, %p3177_p1  ;;  %p2828_p10 = por %p112_p3, %p3178_p6 }
  0xa1   : > { %p2834_p2 = por %p3180_p13, %p106_p12  ;;  %s1664_s26 = sshll.u32 %s301_s24, 6 }
  0xa2   : > { %s3179_s17 = scalar_select %p2828_p10, 1, 0 }
  0xa3   : > { %s3181_s1 = scalar_select %p2834_p2, 1, 0 }
  0xa4   : > { %s3182_s19 = scalar_select %p2838_p4, 1, 0 }
  0xa5   : > { %s1772_s7 = sshll.u32 %s2465_s9, 10  ;;  %s303_s13 = scalar_lea.vmem [#allocation8], %s1664_s26 }
  0xa6   : > { %s2846_s15 = scalar_lea.hbm %s3119_s2, %s1772_s7  ;;  %s310_s30 = sshll.u32 %s303_s13, 4  ;;  %s2854_s30 = int_to_ptr.vmem [resolvable:$true] %s310_s30 }
  0xa7   : > { %p3183_p8 = scmp.lt.s32.totalorder %s2469_s10, 4  ;;  %s2281_s14 = scalar_lea.hbm %s2846_s15, 1024 }
  0xa8   : > { %p2282_p7 = scmp.ne.s32.totalorder %s2846_s15, %s2281_s14  ;;  %s2286_s26 = scalar_lea.hbm %s3119_s2, 4096 }
  0xa9   : > { %p2850_p0 = pnand %p3183_p8, %p108_p9  ;;  %p2287_p1 = scmp.lt.u32.totalorder %s2846_s15, %s3119_s2 }
  0xaa   : > { %p2288_p9 = scmp.lt.u32.totalorder %s2286_s26, %s2281_s14  ;;  %p2290_p13 = scmp.lt.u32.totalorder %s2281_s14, %s2846_s15 }
  0xab   : > { %p2283_p12 = pneg %p2850_p0 }
  0xac   : > { %p2289_p6 = por %p2288_p9, %p2287_p1 }
  0xad   : > { %p2284_p3 = pnand %p2283_p12, %p2282_p7 }
  0xae   : > { %p2291_p8 = por %p2290_p13, %p2289_p6 }
  0xaf   : > { %p2285_p5 = pneg %p2284_p3 }
  0xb1   : > { %p2292_p4 = pnand %p2291_p8, %p2285_p5 }
  0xb3   : > { %2295 = shalt.err (!%p2292_p4)
}
  0xb4   : > { %s2296_s3 = scalar_lea.vmem %s2854_s30, 1024  ;;  %s2480_s13 = smov [#allocation8]  }
  0xb5   : > { %p2297_p7 = scmp.ne.s32.totalorder %s2854_s30, %s2296_s3  ;;  %s2301_s25 = sshll.u32 %s2480_s13, 4  ;;  %s2302_s25 = int_to_ptr.vmem [resolvable:$false] %s2301_s25 }
  0xb6   : > { %s2303_s24 = scalar_lea.vmem %s2302_s25, 2048  ;;  %p2304_p10 = scmp.lt.s32.totalorder %s2854_s30, %s2302_s25 }
  0xb7   : > { %p2299_p3 = pnand %p2297_p7, %p2283_p12  ;;  %p2305_p1 = scmp.lt.s32.totalorder %s2303_s24, %s2296_s3 }
  0xb9   : > { %p2300_p2 = pneg %p2299_p3  ;;  %p2306_p9 = por %p2305_p1, %p2304_p10 }
  0xbb   : > { %p2307_p6 = pnand %p2306_p9, %p2300_p2 }
  0xbd   : > { %2310 = shalt.err (!%p2307_p6)
}
  0xbe   : > { %s3185_s14 = smov 4   ;;  %s3186_s26 = smov 64  }
  0xbf   : > { %1935 = dma.hbm_to_vmem [thread:$0]  (!%p2850_p0), %s2846_s15, 1024, %s2854_s30, %s2694_s20, %s3186_s26, %s3186_s26, %s3185_s14  }
  0xc0   : > { %p3187_p4 = scmp.ne.s32.totalorder %s3153_s12, 0 }
  0xc1   : > { %s324_s7 = sand.u32 (!%p3187_p4), 1, %s2445_s28  }
  0xc2   : > { %322 = sbr.rel (%p3187_p4) target bundleno = 829 (0x33d), region = 44  ;;  %s1668_s27 = sshll.u32 (!%p3187_p4), %s324_s7, 7 }
  0xc3   : > { %s325_s3 = scalar_lea.sflag (!%p3187_p4), [#allocation4], %s324_s7  ;;  %s2888_s13 = scalar_lea.vmem (!%p3187_p4), [#allocation3], %s1668_s27 }
  0xc9   : > { %2396 = dma.done.wait (%p2764_p11), %s325_s3, 2048  }
  0xca   : > { %2398 = vsyncadd (%p2764_p11), %s325_s3, 4294965248  ;;  %s3188_s6 = sld [smem:[#allocation18_spill]]  ;;  %s3189_s25 = sld [smem:[#allocation25_spill]] }
  0xcb   : > { %s333_s24 = sand.u32 1, %s2592_s11  }
  0xcc   : > { %s334_s12 = scalar_lea.sflag [#allocation7], %s333_s24 }
  0xd0   : > { %s335_s20 = sand.u32 1, %s3188_s6   ;;  %p3190_p10 = scmp.ne.s32.totalorder %s3189_s25, 0 }
  0xd1   : > { %s1669_s15 = sshll.u32 %s335_s20, 7 }
  0xd2   : > { %s2896_s30 = scalar_lea.vmem [#allocation6], %s1669_s15 }
  0xd3   : > { %2400 = dma.done.wait (%p3190_p10), %s334_s12, 2048  }
  0xd4   : > { %2402 = vsyncadd (%p3190_p10), %s334_s12, 4294965248  ;;  %s2903_s14 = sand.u32 1, %s2421_s22   ;;  %p3191_p11 = scmp.ne.s32.totalorder %s3179_s17, 0 }
  0xd5   : > { %s1670_s18 = sshll.u32 %s2903_s14, 6 }
  0xd6   : > { %s2906_s26 = scalar_lea.vmem [#allocation8], %s1670_s18 }
  0xd7   : > { %2404 = dma.done.wait (%p3191_p11), %s334_s12, 1024  }
  0xd8   : > { %2406 = vsyncadd (%p3191_p11), %s334_s12, 4294966272  ;;  %p3192_p2 = scmp.eq.s32.totalorder %s2592_s11, 0 }
  0xda   : > { %2408 = dma.done.wait (%p3192_p2), [#allocation10], 4096   ;;  %p3193_p0 = pmov %p3192_p2 }
  0xdb   : > { %s1673_s7 = sshll.u32 %s2903_s14, 7  ;;  %s3194_s3 = sld [smem:[#allocation20_spill]] }
  0xdc   : > { %2410 = vsyncadd (%p3193_p0), [#allocation10], 4294963200  ;;  %s2917_s27 = scalar_lea.vmem [#allocation12], %s1673_s7 }
  0xe1   : > { %p1674_p12 = scmp.ne.s32.totalorder %s3194_s3, 0 }
  0xe2   : > { %v2481_v0 = vmov (!%p1674_p12), 0.0  }
  0xe3   : > { %402 = sbr.rel (%p1674_p12) target bundleno = 235 (0xeb), region = 68  ;;  %403 = vst [vmem:[#allocation2] sm:$0xff] (!%p1674_p12), %v2481_v0  ;;  %404 = vst [vmem:[#allocation2 + $0x8] sm:$0xff] (!%p1674_p12), %v2481_v0 }
  0xe4   : > { %405 = vst [vmem:[#allocation2 + $0x10] sm:$0xff] (!%p1674_p12), %v2481_v0  ;;  %406 = vst [vmem:[#allocation2 + $0x18] sm:$0xff] (!%p1674_p12), %v2481_v0 }
  0xe5   : > { %407 = vst [vmem:[#allocation2 + $0x20] sm:$0xff] (!%p1674_p12), %v2481_v0  ;;  %408 = vst [vmem:[#allocation2 + $0x28] sm:$0xff] (!%p1674_p12), %v2481_v0 }
  0xe6   : > { %409 = vst [vmem:[#allocation2 + $0x30] sm:$0xff] (!%p1674_p12), %v2481_v0  ;;  %410 = vst [vmem:[#allocation2 + $0x38] sm:$0xff] (!%p1674_p12), %v2481_v0 }
  0xe7   : > { %411 = vst [vmem:[#allocation2 + $0x40] sm:$0xff] (!%p1674_p12), %v2481_v0  ;;  %412 = vst [vmem:[#allocation2 + $0x48] sm:$0xff] (!%p1674_p12), %v2481_v0 }
  0xe8   : > { %413 = vst [vmem:[#allocation2 + $0x50] sm:$0xff] (!%p1674_p12), %v2481_v0  ;;  %414 = vst [vmem:[#allocation2 + $0x58] sm:$0xff] (!%p1674_p12), %v2481_v0 }
  0xe9   : > { %415 = vst [vmem:[#allocation2 + $0x60] sm:$0xff] (!%p1674_p12), %v2481_v0  ;;  %416 = vst [vmem:[#allocation2 + $0x68] sm:$0xff] (!%p1674_p12), %v2481_v0 }
  0xea   : > { %417 = vst [vmem:[#allocation2 + $0x70] sm:$0xff] %v2481_v0  ;;  %418 = vst [vmem:[#allocation2 + $0x78] sm:$0xff] %v2481_v0 }
  0xeb PF: > { %v2069_v1 = vld [vmem:[%s2896_s30 + $0x40] sm:$0xff]   ;;  %v2071_v3 = vld [vmem:[%s2896_s30 + $0x48] sm:$0xff]   ;;  %v2073_v5 = vld [vmem:[%s2896_s30 + $0x50] sm:$0xff]   ;;  %s3195_s11 = sld [smem:[#allocation20_spill]] }
  0xec   : > { %v2070_v2 = vld [vmem:[%s2896_s30] sm:$0xff]   ;;  %1791 = vmatprep.subr.bf16.mxu0 %v2069_v1  ;;  %1855 = vmatprep.subr.bf16.mxu1 %v2069_v1  ;;  %v2072_v4 = vld [vmem:[%s2896_s30 + $0x8] sm:$0xff]   ;;  %v2074_v6 = vld [vmem:[%s2896_s30 + $0x10] sm:$0xff]  }
  0xed   : > { %1792 = vmatpush3.bf16.msra.mxu0 %v2070_v2  ;;  %1863 = vmatpush3.bf16.msra.mxu1 %v2070_v2  ;;  %v2075_v7 = vld [vmem:[%s2896_s30 + $0x58] sm:$0xff]   ;;  %v2077_v9 = vld [vmem:[%s2896_s30 + $0x60] sm:$0xff]   ;;  %v2079_v11 = vld [vmem:[%s2896_s30 + $0x68] sm:$0xff]  }
  0xee   : > { %1793 = vmatprep.subr.bf16.mxu0 %v2071_v3  ;;  %1856 = vmatprep.subr.bf16.mxu1 %v2071_v3  ;;  %v2076_v8 = vld [vmem:[%s2896_s30 + $0x18] sm:$0xff]   ;;  %v2078_v10 = vld [vmem:[%s2896_s30 + $0x20] sm:$0xff]   ;;  %v2080_v14 = vld [vmem:[%s2896_s30 + $0x28] sm:$0xff]  }
  0xef   : > { %v2087_v12 = vld [vmem:[%s2888_s13 + $0x4] ss:$8 sps:$4 sm:$0xff]   ;;  %v2081_v15 = vld [vmem:[%s2896_s30 + $0x70] sm:$0xff]   ;;  %v2083_v17 = vld [vmem:[%s2896_s30 + $0x78] sm:$0xff]  }
  0xf0   : > { %v2090_v13 = vld [vmem:[%s2888_s13 + $0x44] ss:$8 sps:$4 sm:$0xff]   ;;  %691 = vmatprep.mubr.bf16.mxu0 %v2087_v12  ;;  %v2082_v16 = vld [vmem:[%s2896_s30 + $0x30] sm:$0xff]   ;;  %v2084_v18 = vld [vmem:[%s2896_s30 + $0x38] sm:$0xff]  }
  0xf1   : > { %1794 = vmatpush3.bf16.msra.mxu0 %v2072_v4  ;;  %1864 = vmatpush3.bf16.msra.mxu1 %v2072_v4  ;;  %v2085_v19 = vld [vmem:[%s2888_s13] ss:$8 sps:$4 sm:$0xff]   ;;  %v2091_v21 = vld [vmem:[%s2888_s13 + $0x14] ss:$8 sps:$4 sm:$0xff]   ;;  %v2095_v23 = vld [vmem:[%s2888_s13 + $0x10] ss:$8 sps:$4 sm:$0xff]  }
  0xf2   : > { %1795 = vmatprep.subr.bf16.mxu0 %v2073_v5  ;;  %1857 = vmatprep.subr.bf16.mxu1 %v2073_v5  ;;  %v2088_v20 = vld [vmem:[%s2888_s13 + $0x40] ss:$8 sps:$4 sm:$0xff]   ;;  %v2093_v22 = vld [vmem:[%s2888_s13 + $0x54] ss:$8 sps:$4 sm:$0xff]   ;;  %v2096_v24 = vld [vmem:[%s2888_s13 + $0x50] ss:$8 sps:$4 sm:$0xff]  }
  0xf3   : > { %723 = vmatprep.mubr.bf16.mxu1 %v2090_v13  ;;  %v2097_v25 = vld [vmem:[%s2888_s13 + $0x24] ss:$8 sps:$4 sm:$0xff]   ;;  %v2101_v27 = vld [vmem:[%s2888_s13 + $0x20] ss:$8 sps:$4 sm:$0xff]   ;;  %v2103_v29 = vld [vmem:[%s2888_s13 + $0x34] ss:$8 sps:$4 sm:$0xff]  }
  0xf4   : > { %v2099_v26 = vld [vmem:[%s2888_s13 + $0x64] ss:$8 sps:$4 sm:$0xff]   ;;  %v2102_v28 = vld [vmem:[%s2888_s13 + $0x60] ss:$8 sps:$4 sm:$0xff]   ;;  %v2105_v30 = vld [vmem:[%s2888_s13 + $0x74] ss:$8 sps:$4 sm:$0xff]  }
  0xf5   : > { %1796 = vmatpush3.bf16.msra.mxu0 %v2074_v6  ;;  %1865 = vmatpush3.bf16.msra.mxu1 %v2074_v6  ;;  %v2107_v31 = vld [vmem:[%s2888_s13 + $0x30] ss:$8 sps:$4 sm:$0xff]   ;;  %v467_v35 = vld [vmem:[#allocation2] sm:$0xff]  ;;  %v468_v43 = vld [vmem:[#allocation2 + $0x8] sm:$0xff]  ;;  %p1707_p5 = scmp.ne.s32.totalorder %s3195_s11, 1 }
  0xf6   : > { %1797 = vmatprep.subr.bf16.mxu0 %v2075_v7  ;;  %1858 = vmatprep.subr.bf16.mxu1 %v2075_v7  ;;  %v2108_v32 = vld [vmem:[%s2888_s13 + $0x70] ss:$8 sps:$4 sm:$0xff]   ;;  %v475_v37 = vld [vmem:[#allocation2 + $0x40] sm:$0xff]  ;;  %v476_v45 = vld [vmem:[#allocation2 + $0x48] sm:$0xff]  ;;  %s3196_s6 = sld [smem:[#allocation28_spill]] (!%p1707_p5) }
  0xf7   : > { %v469_v55 = vld [vmem:[#allocation2 + $0x10] sm:$0xff]  ;;  %v470_v63 = vld [vmem:[#allocation2 + $0x18] sm:$0xff]  ;;  %v479_v13 = vld [vmem:[#allocation2 + $0x60] sm:$0xff] }
  0xf8   : > { %v477_v57 = vld [vmem:[#allocation2 + $0x50] sm:$0xff]  ;;  %v478_v1 = vld [vmem:[#allocation2 + $0x58] sm:$0xff] }
  0xf9   : > { %1798 = vmatpush3.bf16.msra.mxu0 %v2076_v8  ;;  %1866 = vmatpush3.bf16.msra.mxu1 %v2076_v8 }
  0xfa   : > { %1799 = vmatprep.subr.bf16.mxu0 %v2077_v9  ;;  %1859 = vmatprep.subr.bf16.mxu1 %v2077_v9 }
  0xfd   : > { %1800 = vmatpush3.bf16.msra.mxu0 %v2078_v10  ;;  %1867 = vmatpush3.bf16.msra.mxu1 %v2078_v10 }
  0xfe   : > { %1801 = vmatprep.subr.bf16.mxu0 %v2079_v11  ;;  %1860 = vmatprep.subr.bf16.mxu1 %v2079_v11  ;;  %v471_v11 = vld [vmem:[#allocation2 + $0x20] sm:$0xff] }
 0x101   : > { %1802 = vmatpush3.bf16.msra.mxu0 %v2080_v14  ;;  %1868 = vmatpush3.bf16.msra.mxu1 %v2080_v14 }
 0x102   : > { %1803 = vmatprep.subr.bf16.mxu0 %v2081_v15  ;;  %1861 = vmatprep.subr.bf16.mxu1 %v2081_v15 }
 0x105   : > { %1804 = vmatpush3.bf16.msra.mxu0 %v2082_v16  ;;  %1869 = vmatpush3.bf16.msra.mxu1 %v2082_v16 }
 0x106   : > { %1805 = vmatprep.subr.bf16.mxu0 %v2083_v17  ;;  %1862 = vmatprep.subr.bf16.mxu1 %v2083_v17 }
 0x109   : > { %1806 = vmatpush3.bf16.msra.mxu0 %v2084_v18  ;;  %1870 = vmatpush3.bf16.msra.mxu1 %v2084_v18 }
 0x10c   : > { %692 = vmatmul.mubr.bf16.vlgmr.msra.gmra.mrb[0].mxu0 %v2085_v19  ;;  %724 = vmatmul.mubr.bf16.vlgmr.msra.gmra.mrb[0].mxu1 %v2088_v20  ;;  %v472_v19 = vld [vmem:[#allocation2 + $0x28] sm:$0xff] }
 0x10d   : > { %699 = vmatprep.mubr.bf16.mxu0 %v2091_v21  ;;  %731 = vmatprep.mubr.bf16.mxu1 %v2093_v22  ;;  %v480_v21 = vld [vmem:[#allocation2 + $0x68] sm:$0xff] }
 0x114   : > { %700 = vmatmul.mubr.bf16.gmra.mrb[4].mxu0 %v2095_v23  ;;  %732 = vmatmul.mubr.bf16.gmra.mrb[4].mxu1 %v2096_v24 }
 0x115   : > { %707 = vmatprep.mubr.bf16.mxu0 %v2097_v25  ;;  %739 = vmatprep.mubr.bf16.mxu1 %v2099_v26 }
 0x11c   : > { %708 = vmatmul.mubr.bf16.gmra.mrb[8].mxu0 %v2101_v27  ;;  %740 = vmatmul.mubr.bf16.gmra.mrb[8].mxu1 %v2102_v28 }
 0x11d   : > { %715 = vmatprep.mubr.bf16.mxu0 %v2103_v29  ;;  %747 = vmatprep.mubr.bf16.mxu1 %v2105_v30 }
 0x124   : > { %716 = vmatmul.mubr.bf16.gmra.mrb[12].mxu0 %v2107_v31  ;;  %748 = vmatmul.mubr.bf16.gmra.mrb[12].mxu1 %v2108_v32  ;;  %v473_v31 = vld [vmem:[#allocation2 + $0x30] sm:$0xff] }
 0x1df   : > { %v1807_v33 = vpop.f32.mrb[0].mxu0  ;;  %v1831_v34 = vpop.f32.mrb[0].mxu1 }
 0x1e0   : > { %v1808_v36 = vpop.f32.mrb[1].mxu0  ;;  %v1832_v38 = vpop.f32.mrb[1].mxu1 }
 0x1e1   : > { %v1809_v39 = vadd.f32 %v1808_v36, %v1807_v33  ;;  %v1833_v40 = vadd.f32 %v1832_v38, %v1831_v34  ;;  %v1810_v41 = vpop.f32.mrb[2].mxu0  ;;  %v1834_v42 = vpop.f32.mrb[2].mxu1  ;;  %v481_v33 = vld [vmem:[#allocation2 + $0x70] sm:$0xff] }
 0x1e2   : > { %v1811_v44 = vpop.f32.mrb[3].mxu0  ;;  %v1835_v46 = vpop.f32.mrb[3].mxu1 }
 0x1e3   : > { %v756_v47 = vadd.f32 %v1809_v39, %v467_v35  ;;  %v764_v48 = vadd.f32 %v1833_v40, %v475_v37  ;;  %v1812_v49 = vadd.f32 %v1811_v44, %v1810_v41  ;;  %v1836_v50 = vadd.f32 %v1835_v46, %v1834_v42  ;;  %v474_v39 = vld [vmem:[#allocation2 + $0x38] sm:$0xff] }
 0x1e4   : > { %v482_v41 = vld [vmem:[#allocation2 + $0x78] sm:$0xff] }
 0x1e5   : > { %772 = vst [vmem:[#allocation2] sm:$0xff] %v756_v47  ;;  %780 = vst [vmem:[#allocation2 + $0x40] sm:$0xff] %v764_v48  ;;  %v757_v51 = vadd.f32 %v1812_v49, %v468_v43  ;;  %v765_v52 = vadd.f32 %v1836_v50, %v476_v45  ;;  %v2109_v49 = vld [vmem:[#allocation11 + $0x4] ss:$8 sps:$4 sm:$0xff] (!%p1707_p5)  }
 0x1e6   : > { %v2111_v50 = vld [vmem:[#allocation9 + $0x4] ss:$8 sps:$4 sm:$0xff] (!%p1707_p5)   ;;  %944 = vmatprep.subr.bf16.mxu1 (!%p1707_p5), %v2109_v49  ;;  %v2164_v49 = vld [vmem:[%s2906_s26 + $0x38] sm:$0xff] (!%p1707_p5)  }
 0x1e7   : > { %773 = vst [vmem:[#allocation2 + $0x8] sm:$0xff] %v757_v51  ;;  %781 = vst [vmem:[#allocation2 + $0x48] sm:$0xff] %v765_v52  ;;  %v1813_v53 = vpop.f32.mrb[4].mxu0  ;;  %v1837_v54 = vpop.f32.mrb[4].mxu1  ;;  %v2482_v51 = vmov (!%p1707_p5), 0   ;;  %1185 = vmatprep.subr.bf16.mxu0 (!%p1707_p5), %v2111_v50  ;;  %v1300_v50 = vlaneseq (!%p1707_p5) }
 0x1e8   : > { %v1814_v56 = vpop.f32.mrb[5].mxu0  ;;  %v1838_v58 = vpop.f32.mrb[5].mxu1  ;;  %976 = vmatprep.mubr.bf16.mxu1 (!%p1707_p5), %v2482_v51  ;;  %1217 = vmatprep.mubr.bf16.mxu0 (!%p1707_p5), %v2482_v51  ;;  %v2113_v52 = vld [vmem:[#allocation11] ss:$8 sps:$4 sm:$0xff] (!%p1707_p5)  }
 0x1e9   : > { %v1815_v59 = vadd.f32 %v1814_v56, %v1813_v53  ;;  %v1839_v60 = vadd.f32 %v1838_v58, %v1837_v54  ;;  %v1816_v61 = vpop.f32.mrb[6].mxu0  ;;  %v1840_v62 = vpop.f32.mrb[6].mxu1  ;;  %v2114_v53 = vld [vmem:[#allocation9] ss:$8 sps:$4 sm:$0xff] (!%p1707_p5)   ;;  %v2115_v54 = vld [vmem:[#allocation11 + $0x14] ss:$8 sps:$4 sm:$0xff] (!%p1707_p5)   ;;  %945 = vmatpush1.bf16.msra.mxu1 (!%p1707_p5), %v2113_v52 }
 0x1ea   : > { %v1817_v0 = vpop.f32.mrb[7].mxu0  ;;  %v1841_v2 = vpop.f32.mrb[7].mxu1  ;;  %1186 = vmatpush1.bf16.msra.mxu0 (!%p1707_p5), %v2114_v53  ;;  %v2119_v56 = vld [vmem:[#allocation11 + $0x10] ss:$8 sps:$4 sm:$0xff] (!%p1707_p5)   ;;  %946 = vmatprep.subr.bf16.mxu1 (!%p1707_p5), %v2115_v54  ;;  %v2121_v58 = vld [vmem:[#allocation11 + $0x24] ss:$8 sps:$4 sm:$0xff] (!%p1707_p5)  }
 0x1eb   : > { %v758_v3 = vadd.f32 %v1815_v59, %v469_v55  ;;  %v766_v4 = vadd.f32 %v1839_v60, %v477_v57  ;;  %v1818_v5 = vadd.f32 %v1817_v0, %v1816_v61  ;;  %v1842_v6 = vadd.f32 %v1841_v2, %v1840_v62  ;;  %v2117_v55 = vld [vmem:[#allocation9 + $0x14] ss:$8 sps:$4 sm:$0xff] (!%p1707_p5)   ;;  %v2120_v57 = vld [vmem:[#allocation9 + $0x10] ss:$8 sps:$4 sm:$0xff] (!%p1707_p5)   ;;  %v2123_v59 = vld [vmem:[#allocation9 + $0x24] ss:$8 sps:$4 sm:$0xff] (!%p1707_p5)  }
 0x1ec   : > { %1187 = vmatprep.subr.bf16.mxu0 (!%p1707_p5), %v2117_v55  ;;  %v2125_v60 = vld [vmem:[#allocation11 + $0x20] ss:$8 sps:$4 sm:$0xff] (!%p1707_p5)   ;;  %v2127_v62 = vld [vmem:[#allocation11 + $0x34] ss:$8 sps:$4 sm:$0xff] (!%p1707_p5)   ;;  %v2131_v0 = vld [vmem:[#allocation11 + $0x30] ss:$8 sps:$4 sm:$0xff] (!%p1707_p5)  }
 0x1ed   : > { %774 = vst [vmem:[#allocation2 + $0x10] sm:$0xff] %v758_v3  ;;  %782 = vst [vmem:[#allocation2 + $0x50] sm:$0xff] %v766_v4  ;;  %v759_v7 = vadd.f32 %v1818_v5, %v470_v63  ;;  %v767_v8 = vadd.f32 %v1842_v6, %v478_v1  ;;  %v2126_v61 = vld [vmem:[#allocation9 + $0x20] ss:$8 sps:$4 sm:$0xff] (!%p1707_p5)   ;;  %947 = vmatpush1.bf16.msra.mxu1 (!%p1707_p5), %v2119_v56  ;;  %v2129_v63 = vld [vmem:[#allocation9 + $0x34] ss:$8 sps:$4 sm:$0xff] (!%p1707_p5)  }
 0x1ee   : > { %1188 = vmatpush1.bf16.msra.mxu0 (!%p1707_p5), %v2120_v57  ;;  %948 = vmatprep.subr.bf16.mxu1 (!%p1707_p5), %v2121_v58  ;;  %v2132_v1 = vld [vmem:[#allocation9 + $0x30] ss:$8 sps:$4 sm:$0xff] (!%p1707_p5)   ;;  %v2133_v2 = vld [vmem:[#allocation11 + $0x44] ss:$8 sps:$4 sm:$0xff] (!%p1707_p5)   ;;  %v2137_v4 = vld [vmem:[#allocation11 + $0x40] ss:$8 sps:$4 sm:$0xff] (!%p1707_p5)  }
 0x1ef   : > { %775 = vst [vmem:[#allocation2 + $0x18] sm:$0xff] %v759_v7  ;;  %783 = vst [vmem:[#allocation2 + $0x58] sm:$0xff] %v767_v8  ;;  %v1819_v9 = vpop.f32.mrb[8].mxu0  ;;  %v1843_v10 = vpop.f32.mrb[8].mxu1  ;;  %1189 = vmatprep.subr.bf16.mxu0 (!%p1707_p5), %v2123_v59  ;;  %v2135_v3 = vld [vmem:[#allocation9 + $0x44] ss:$8 sps:$4 sm:$0xff] (!%p1707_p5)  }
 0x1f0   : > { %v1820_v12 = vpop.f32.mrb[9].mxu0  ;;  %v1844_v14 = vpop.f32.mrb[9].mxu1  ;;  %v2138_v5 = vld [vmem:[#allocation9 + $0x40] ss:$8 sps:$4 sm:$0xff] (!%p1707_p5)   ;;  %v2139_v6 = vld [vmem:[#allocation11 + $0x54] ss:$8 sps:$4 sm:$0xff] (!%p1707_p5)  }
 0x1f1   : > { %v1821_v15 = vadd.f32 %v1820_v12, %v1819_v9  ;;  %v1845_v16 = vadd.f32 %v1844_v14, %v1843_v10  ;;  %v1822_v17 = vpop.f32.mrb[10].mxu0  ;;  %v1846_v18 = vpop.f32.mrb[10].mxu1  ;;  %949 = vmatpush1.bf16.msra.mxu1 (!%p1707_p5), %v2125_v60  ;;  %v2141_v7 = vld [vmem:[#allocation9 + $0x54] ss:$8 sps:$4 sm:$0xff] (!%p1707_p5)   ;;  %v2143_v8 = vld [vmem:[#allocation11 + $0x50] ss:$8 sps:$4 sm:$0xff] (!%p1707_p5)  }
 0x1f2   : > { %v1823_v20 = vpop.f32.mrb[11].mxu0  ;;  %v1847_v22 = vpop.f32.mrb[11].mxu1  ;;  %1190 = vmatpush1.bf16.msra.mxu0 (!%p1707_p5), %v2126_v61  ;;  %950 = vmatprep.subr.bf16.mxu1 (!%p1707_p5), %v2127_v62  ;;  %v2144_v9 = vld [vmem:[#allocation9 + $0x50] ss:$8 sps:$4 sm:$0xff] (!%p1707_p5)   ;;  %v2145_v10 = vld [vmem:[#allocation11 + $0x64] ss:$8 sps:$4 sm:$0xff] (!%p1707_p5)  }
 0x1f3   : > { %v760_v23 = vadd.f32 %v1821_v15, %v471_v11  ;;  %v768_v24 = vadd.f32 %v1845_v16, %v479_v13  ;;  %v1824_v25 = vadd.f32 %v1823_v20, %v1822_v17  ;;  %v1848_v26 = vadd.f32 %v1847_v22, %v1846_v18  ;;  %1191 = vmatprep.subr.bf16.mxu0 (!%p1707_p5), %v2129_v63  ;;  %v2147_v11 = vld [vmem:[#allocation9 + $0x64] ss:$8 sps:$4 sm:$0xff] (!%p1707_p5)   ;;  %v2149_v12 = vld [vmem:[#allocation11 + $0x60] ss:$8 sps:$4 sm:$0xff] (!%p1707_p5)   ;;  %v2151_v14 = vld [vmem:[#allocation11 + $0x74] ss:$8 sps:$4 sm:$0xff] (!%p1707_p5)  }
 0x1f4   : > { %v2150_v13 = vld [vmem:[#allocation9 + $0x60] ss:$8 sps:$4 sm:$0xff] (!%p1707_p5)   ;;  %v2153_v15 = vld [vmem:[#allocation9 + $0x74] ss:$8 sps:$4 sm:$0xff] (!%p1707_p5)   ;;  %v2155_v16 = vld [vmem:[#allocation11 + $0x70] ss:$8 sps:$4 sm:$0xff] (!%p1707_p5)  }
 0x1f5   : > { %776 = vst [vmem:[#allocation2 + $0x20] sm:$0xff] %v760_v23  ;;  %784 = vst [vmem:[#allocation2 + $0x60] sm:$0xff] %v768_v24  ;;  %v761_v27 = vadd.f32 %v1824_v25, %v472_v19  ;;  %v769_v28 = vadd.f32 %v1848_v26, %v480_v21  ;;  %951 = vmatpush1.bf16.msra.mxu1 (!%p1707_p5), %v2131_v0  ;;  %v2156_v17 = vld [vmem:[#allocation9 + $0x70] ss:$8 sps:$4 sm:$0xff] (!%p1707_p5)   ;;  %v824_v18 = vld [vmem:[#allocation2] sm:$0xff] (!%p1707_p5)  ;;  %v1301_v52 = vshrl.u32 (!%p1707_p5), %v1300_v50, 7 }
 0x1f6   : > { %1192 = vmatpush1.bf16.msra.mxu0 (!%p1707_p5), %v2132_v1  ;;  %952 = vmatprep.subr.bf16.mxu1 (!%p1707_p5), %v2133_v2  ;;  %v825_v19 = vld [vmem:[#allocation2 + $0x8] sm:$0xff] (!%p1707_p5)  ;;  %v2157_v21 = vld [vmem:[%s2906_s26] sm:$0xff] (!%p1707_p5)   ;;  %v826_v22 = vld [vmem:[#allocation2 + $0x10] sm:$0xff] (!%p1707_p5) }
 0x1f7   : > { %777 = vst [vmem:[#allocation2 + $0x28] sm:$0xff] %v761_v27  ;;  %785 = vst [vmem:[#allocation2 + $0x68] sm:$0xff] %v769_v28  ;;  %v1825_v29 = vpop.f32.mrb[12].mxu0  ;;  %v1849_v30 = vpop.f32.mrb[12].mxu1  ;;  %1193 = vmatprep.subr.bf16.mxu0 (!%p1707_p5), %v2135_v3  ;;  %v840_v20 = vpack.c.bf16 (!%p1707_p5), %v825_v19, %v824_v18  ;;  %v827_v23 = vld [vmem:[#allocation2 + $0x18] sm:$0xff] (!%p1707_p5)  ;;  %v2158_v25 = vld [vmem:[%s2906_s26 + $0x8] sm:$0xff] (!%p1707_p5)  }
 0x1f8   : > { %v1826_v32 = vpop.f32.mrb[13].mxu0  ;;  %v1850_v34 = vpop.f32.mrb[13].mxu1  ;;  %v841_v24 = vpack.c.bf16 (!%p1707_p5), %v827_v23, %v826_v22  ;;  %v1302_v53 = vsub.s32 (!%p1707_p5), 0, %v1301_v52  ;;  %v1298_v54 = vld [vmem:[%s3196_s6] sm:$0x3] (!%p1707_p5)  ;;  %v1306_v55 = vsub.s32 (!%p1707_p5), 1, %v1301_v52 }
 0x1f9   : > { %v1827_v35 = vadd.f32 %v1826_v32, %v1825_v29  ;;  %v1851_v36 = vadd.f32 %v1850_v34, %v1849_v30  ;;  %v1828_v37 = vpop.f32.mrb[14].mxu0  ;;  %v1852_v38 = vpop.f32.mrb[14].mxu1  ;;  %791 = sbr.rel (%p1707_p5) target bundleno = 801 (0x321), region = 72  ;;  %953 = vmatpush1.bf16.msra.mxu1 (!%p1707_p5), %v2137_v4  ;;  %v2159_v29 = vld [vmem:[%s2906_s26 + $0x10] sm:$0xff] (!%p1707_p5)   ;;  %v832_v34 = vld [vmem:[#allocation2 + $0x40] sm:$0xff] (!%p1707_p5) }
 0x1fa   : > { %v1829_v40 = vpop.f32.mrb[15].mxu0  ;;  %v1853_v42 = vpop.f32.mrb[15].mxu1  ;;  %1194 = vmatpush1.bf16.msra.mxu0 (!%p1707_p5), %v2138_v5  ;;  %954 = vmatprep.subr.bf16.mxu1 (!%p1707_p5), %v2139_v6  ;;  %v2980_v56 = vrot.slane (!%p1707_p5), %v1298_v54, %v1302_v53  ;;  %v2982_v59 = vrot.slane (!%p1707_p5), %v1298_v54, %v1306_v55 }
 0x1fb   : > { %v762_v43 = vadd.f32 %v1827_v35, %v473_v31  ;;  %v770_v44 = vadd.f32 %v1851_v36, %v481_v33  ;;  %v1830_v45 = vadd.f32 %v1829_v40, %v1828_v37  ;;  %v1854_v46 = vadd.f32 %v1853_v42, %v1852_v38  ;;  %1195 = vmatprep.subr.bf16.mxu0 (!%p1707_p5), %v2141_v7  ;;  %v2160_v33 = vld [vmem:[%s2906_s26 + $0x18] sm:$0xff] (!%p1707_p5)   ;;  %v833_v35 = vld [vmem:[#allocation2 + $0x48] sm:$0xff] (!%p1707_p5)  ;;  %v2161_v37 = vld [vmem:[%s2906_s26 + $0x20] sm:$0xff] (!%p1707_p5)  }
 0x1fc   : > { %v828_v26 = vld [vmem:[#allocation2 + $0x20] sm:$0xff] (!%p1707_p5)  ;;  %v844_v36 = vpack.c.bf16 (!%p1707_p5), %v833_v35, %v832_v34  ;;  %v834_v38 = vld [vmem:[#allocation2 + $0x50] sm:$0xff] (!%p1707_p5) }
 0x1fd   : > { %778 = vst [vmem:[#allocation2 + $0x30] sm:$0xff] %v762_v43  ;;  %786 = vst [vmem:[#allocation2 + $0x70] sm:$0xff] %v770_v44  ;;  %v763_v47 = vadd.f32 %v1830_v45, %v474_v39  ;;  %v771_v48 = vadd.f32 %v1854_v46, %v482_v41  ;;  %955 = vmatpush1.bf16.msra.mxu1 (!%p1707_p5), %v2143_v8  ;;  %v835_v39 = vld [vmem:[#allocation2 + $0x58] sm:$0xff] (!%p1707_p5)  ;;  %v2162_v41 = vld [vmem:[%s2906_s26 + $0x28] sm:$0xff] (!%p1707_p5)  }
 0x1fe   : > { %1196 = vmatpush1.bf16.msra.mxu0 (!%p1707_p5), %v2144_v9  ;;  %956 = vmatprep.subr.bf16.mxu1 (!%p1707_p5), %v2145_v10  ;;  %v829_v27 = vld [vmem:[#allocation2 + $0x28] sm:$0xff] (!%p1707_p5)  ;;  %v845_v40 = vpack.c.bf16 (!%p1707_p5), %v835_v39, %v834_v38  ;;  %v836_v42 = vld [vmem:[#allocation2 + $0x60] sm:$0xff] (!%p1707_p5)  ;;  %v2163_v45 = vld [vmem:[%s2906_s26 + $0x30] sm:$0xff] (!%p1707_p5)  }
 0x1ff   : > { %779 = vst [vmem:[#allocation2 + $0x38] sm:$0xff] %v763_v47  ;;  %787 = vst [vmem:[#allocation2 + $0x78] sm:$0xff] %v771_v48  ;;  %1197 = vmatprep.subr.bf16.mxu0 (!%p1707_p5), %v2147_v11  ;;  %v842_v28 = vpack.c.bf16 (!%p1707_p5), %v829_v27, %v828_v26  ;;  %v837_v43 = vld [vmem:[#allocation2 + $0x68] sm:$0xff] (!%p1707_p5) }
 0x200   : > { %v846_v44 = vpack.c.bf16 %v837_v43, %v836_v42 }
 0x201   : > { %957 = vmatpush1.bf16.msra.mxu1 %v2149_v12 }
 0x202   : > { %1198 = vmatpush1.bf16.msra.mxu0 %v2150_v13  ;;  %958 = vmatprep.subr.bf16.mxu1 %v2151_v14 }
 0x203   : > { %1199 = vmatprep.subr.bf16.mxu0 %v2153_v15 }
 0x204   : > { %v830_v30 = vld [vmem:[#allocation2 + $0x30] sm:$0xff] }
 0x205   : > { %959 = vmatpush1.bf16.msra.mxu1 %v2155_v16  ;;  %v838_v46 = vld [vmem:[#allocation2 + $0x70] sm:$0xff] }
 0x206   : > { %1200 = vmatpush1.bf16.msra.mxu0 %v2156_v17  ;;  %v831_v31 = vld [vmem:[#allocation2 + $0x38] sm:$0xff] }
 0x207   : > { %v843_v32 = vpack.c.bf16 %v831_v31, %v830_v30  ;;  %v839_v47 = vld [vmem:[#allocation2 + $0x78] sm:$0xff] }
 0x208   : > { %977 = vmatmul.mubr.bf16.vlgmr.msra.gmra.mrb[0].mxu1 %v840_v20  ;;  %v847_v48 = vpack.c.bf16 %v839_v47, %v838_v46 }
 0x209   : > { %1218 = vmatmul.mubr.bf16.vlgmr.msra.gmra.mrb[0].mxu0 %v2157_v21  ;;  %986 = vmatprep.mubr.bf16.mxu1 %v2482_v51 }
 0x20a   : > { %1227 = vmatprep.mubr.bf16.mxu0 %v2482_v51 }
 0x210   : > { %987 = vmatmul.mubr.bf16.gmra.mrb[4].mxu1 %v841_v24 }
 0x211   : > { %1228 = vmatmul.mubr.bf16.gmra.mrb[4].mxu0 %v2158_v25  ;;  %996 = vmatprep.mubr.bf16.mxu1 %v2482_v51 }
 0x212   : > { %1237 = vmatprep.mubr.bf16.mxu0 %v2482_v51 }
 0x218   : > { %997 = vmatmul.mubr.bf16.gmra.mrb[8].mxu1 %v842_v28 }
 0x219   : > { %1238 = vmatmul.mubr.bf16.gmra.mrb[8].mxu0 %v2159_v29  ;;  %1006 = vmatprep.mubr.bf16.mxu1 %v2482_v51 }
 0x21a   : > { %1247 = vmatprep.mubr.bf16.mxu0 %v2482_v51 }
 0x220   : > { %1007 = vmatmul.mubr.bf16.gmra.mrb[12].mxu1 %v843_v32 }
 0x221   : > { %1248 = vmatmul.mubr.bf16.gmra.mrb[12].mxu0 %v2160_v33  ;;  %1016 = vmatprep.mubr.bf16.mxu1 %v2482_v51 }
 0x222   : > { %1257 = vmatprep.mubr.bf16.mxu0 %v2482_v51 }
 0x228   : > { %1017 = vmatmul.mubr.bf16.gmra.mrb[16].mxu1 %v844_v36 }
 0x229   : > { %1258 = vmatmul.mubr.bf16.gmra.mrb[16].mxu0 %v2161_v37  ;;  %1026 = vmatprep.mubr.bf16.mxu1 %v2482_v51 }
 0x22a   : > { %1267 = vmatprep.mubr.bf16.mxu0 %v2482_v51 }
 0x230   : > { %1027 = vmatmul.mubr.bf16.gmra.mrb[20].mxu1 %v845_v40 }
 0x231   : > { %1268 = vmatmul.mubr.bf16.gmra.mrb[20].mxu0 %v2162_v41  ;;  %1036 = vmatprep.mubr.bf16.mxu1 %v2482_v51 }
 0x232   : > { %1277 = vmatprep.mubr.bf16.mxu0 %v2482_v51 }
 0x238   : > { %1037 = vmatmul.mubr.bf16.gmra.mrb[24].mxu1 %v846_v44 }
 0x239   : > { %1278 = vmatmul.mubr.bf16.gmra.mrb[24].mxu0 %v2163_v45  ;;  %1046 = vmatprep.mubr.bf16.mxu1 %v2482_v51 }
 0x23a   : > { %1287 = vmatprep.mubr.bf16.mxu0 %v2482_v51 }
 0x240   : > { %1047 = vmatmul.mubr.bf16.gmra.mrb[28].mxu1 %v847_v48 }
 0x241   : > { %1288 = vmatmul.mubr.bf16.gmra.mrb[28].mxu0 %v2164_v49 }
 0x2db   : > { %v978_v57 = vpop.f32.mrb[0].mxu1 }
 0x2dc   : > { %v1219_v58 = vpop.f32.mrb[0].mxu0  ;;  %v980_v60 = vpop.f32.mrb[1].mxu1 }
 0x2dd   : > { %v1220_v51 = vadd.f32 %v1219_v58, %v978_v57  ;;  %v1221_v61 = vpop.f32.mrb[1].mxu0  ;;  %v982_v63 = vpop.f32.mrb[2].mxu1 }
 0x2de   : > { %v1222_v62 = vadd.f32 %v1221_v61, %v980_v60  ;;  %v1223_v0 = vpop.f32.mrb[2].mxu0  ;;  %v984_v3 = vpop.f32.mrb[3].mxu1 }
 0x2df   : > { %v1310_v1 = vadd.f32 %v2980_v56, %v1220_v51  ;;  %v1224_v2 = vadd.f32 %v1223_v0, %v982_v63  ;;  %v1225_v4 = vpop.f32.mrb[3].mxu0 }
 0x2e0   : > { %v1311_v5 = vadd.f32 %v2982_v59, %v1222_v62  ;;  %v1226_v6 = vadd.f32 %v1225_v4, %v984_v3 }
 0x2e1   : > { %v1342_v7 = vmax.f32 %v1310_v1, 0.0  ;;  %v1312_v8 = vadd.f32 %v2980_v56, %v1224_v2 }
 0x2e2   : > { %v1343_v9 = vmax.f32 %v1311_v5, 0.0  ;;  %v1313_v10 = vadd.f32 %v2982_v59, %v1226_v6 }
 0x2e3   : > { %v1344_v11 = vmax.f32 %v1312_v8, 0.0  ;;  %v988_v14 = vpop.f32.mrb[4].mxu1 }
 0x2e4   : > { %v1773_v12 = vpack.c.bf16 %v1343_v9, %v1342_v7  ;;  %v1345_v13 = vmax.f32 %v1313_v10, 0.0  ;;  %v1229_v15 = vpop.f32.mrb[4].mxu0  ;;  %v990_v17 = vpop.f32.mrb[5].mxu1 }
 0x2e5   : > { %v1230_v16 = vadd.f32 %v1229_v15, %v988_v14  ;;  %v1231_v18 = vpop.f32.mrb[5].mxu0  ;;  %v992_v21 = vpop.f32.mrb[6].mxu1 }
 0x2e6   : > { %1470 = vst [vmem:[%s2917_s27] sm:$0xff] %v1773_v12  ;;  %v1774_v19 = vpack.c.bf16 %v1345_v13, %v1344_v11  ;;  %v1232_v20 = vadd.f32 %v1231_v18, %v990_v17  ;;  %v1233_v22 = vpop.f32.mrb[6].mxu0  ;;  %v994_v25 = vpop.f32.mrb[7].mxu1 }
 0x2e7   : > { %v1314_v23 = vadd.f32 %v2980_v56, %v1230_v16  ;;  %v1234_v24 = vadd.f32 %v1233_v22, %v992_v21  ;;  %v1235_v26 = vpop.f32.mrb[7].mxu0 }
 0x2e8   : > { %1471 = vst [vmem:[%s2917_s27 + $0x8] sm:$0xff] %v1774_v19  ;;  %v1315_v27 = vadd.f32 %v2982_v59, %v1232_v20  ;;  %v1236_v28 = vadd.f32 %v1235_v26, %v994_v25 }
 0x2e9   : > { %v1346_v29 = vmax.f32 %v1314_v23, 0.0  ;;  %v1316_v30 = vadd.f32 %v2980_v56, %v1234_v24 }
 0x2ea   : > { %v1347_v31 = vmax.f32 %v1315_v27, 0.0  ;;  %v1317_v32 = vadd.f32 %v2982_v59, %v1236_v28 }
 0x2eb   : > { %v1348_v33 = vmax.f32 %v1316_v30, 0.0  ;;  %v998_v36 = vpop.f32.mrb[8].mxu1 }
 0x2ec   : > { %v1775_v34 = vpack.c.bf16 %v1347_v31, %v1346_v29  ;;  %v1349_v35 = vmax.f32 %v1317_v32, 0.0  ;;  %v1239_v37 = vpop.f32.mrb[8].mxu0  ;;  %v1000_v39 = vpop.f32.mrb[9].mxu1 }
 0x2ed   : > { %v1240_v38 = vadd.f32 %v1239_v37, %v998_v36  ;;  %v1241_v40 = vpop.f32.mrb[9].mxu0  ;;  %v1002_v43 = vpop.f32.mrb[10].mxu1 }
 0x2ee   : > { %1472 = vst [vmem:[%s2917_s27 + $0x10] sm:$0xff] %v1775_v34  ;;  %v1776_v41 = vpack.c.bf16 %v1349_v35, %v1348_v33  ;;  %v1242_v42 = vadd.f32 %v1241_v40, %v1000_v39  ;;  %v1243_v44 = vpop.f32.mrb[10].mxu0  ;;  %v1004_v47 = vpop.f32.mrb[11].mxu1 }
 0x2ef   : > { %v1318_v45 = vadd.f32 %v2980_v56, %v1240_v38  ;;  %v1244_v46 = vadd.f32 %v1243_v44, %v1002_v43  ;;  %v1245_v48 = vpop.f32.mrb[11].mxu0 }
 0x2f0   : > { %1473 = vst [vmem:[%s2917_s27 + $0x18] sm:$0xff] %v1776_v41  ;;  %v1319_v49 = vadd.f32 %v2982_v59, %v1242_v42  ;;  %v1246_v50 = vadd.f32 %v1245_v48, %v1004_v47 }
 0x2f1   : > { %v1350_v52 = vmax.f32 %v1318_v45, 0.0  ;;  %v1320_v53 = vadd.f32 %v2980_v56, %v1244_v46 }
 0x2f2   : > { %v1351_v54 = vmax.f32 %v1319_v49, 0.0  ;;  %v1321_v55 = vadd.f32 %v2982_v59, %v1246_v50 }
 0x2f3   : > { %v1352_v57 = vmax.f32 %v1320_v53, 0.0  ;;  %v1008_v60 = vpop.f32.mrb[12].mxu1 }
 0x2f4   : > { %v1777_v58 = vpack.c.bf16 %v1351_v54, %v1350_v52  ;;  %v1353_v51 = vmax.f32 %v1321_v55, 0.0  ;;  %v1249_v61 = vpop.f32.mrb[12].mxu0  ;;  %v1010_v63 = vpop.f32.mrb[13].mxu1 }
 0x2f5   : > { %v1250_v62 = vadd.f32 %v1249_v61, %v1008_v60  ;;  %v1251_v0 = vpop.f32.mrb[13].mxu0  ;;  %v1012_v3 = vpop.f32.mrb[14].mxu1 }
 0x2f6   : > { %1474 = vst [vmem:[%s2917_s27 + $0x20] sm:$0xff] %v1777_v58  ;;  %v1778_v1 = vpack.c.bf16 %v1353_v51, %v1352_v57  ;;  %v1252_v2 = vadd.f32 %v1251_v0, %v1010_v63  ;;  %v1253_v4 = vpop.f32.mrb[14].mxu0  ;;  %v1014_v7 = vpop.f32.mrb[15].mxu1 }
 0x2f7   : > { %v1322_v5 = vadd.f32 %v2980_v56, %v1250_v62  ;;  %v1254_v6 = vadd.f32 %v1253_v4, %v1012_v3  ;;  %v1255_v8 = vpop.f32.mrb[15].mxu0 }
 0x2f8   : > { %1475 = vst [vmem:[%s2917_s27 + $0x28] sm:$0xff] %v1778_v1  ;;  %v1323_v9 = vadd.f32 %v2982_v59, %v1252_v2  ;;  %v1256_v10 = vadd.f32 %v1255_v8, %v1014_v7 }
 0x2f9   : > { %v1354_v11 = vmax.f32 %v1322_v5, 0.0  ;;  %v1324_v12 = vadd.f32 %v2980_v56, %v1254_v6 }
 0x2fa   : > { %v1355_v13 = vmax.f32 %v1323_v9, 0.0  ;;  %v1325_v14 = vadd.f32 %v2982_v59, %v1256_v10 }
 0x2fb   : > { %v1356_v15 = vmax.f32 %v1324_v12, 0.0  ;;  %v1018_v18 = vpop.f32.mrb[16].mxu1 }
 0x2fc   : > { %v1779_v16 = vpack.c.bf16 %v1355_v13, %v1354_v11  ;;  %v1357_v17 = vmax.f32 %v1325_v14, 0.0  ;;  %v1259_v19 = vpop.f32.mrb[16].mxu0  ;;  %v1020_v21 = vpop.f32.mrb[17].mxu1 }
 0x2fd   : > { %v1260_v20 = vadd.f32 %v1259_v19, %v1018_v18  ;;  %v1261_v22 = vpop.f32.mrb[17].mxu0  ;;  %v1022_v25 = vpop.f32.mrb[18].mxu1 }
 0x2fe   : > { %1476 = vst [vmem:[%s2917_s27 + $0x30] sm:$0xff] %v1779_v16  ;;  %v1780_v23 = vpack.c.bf16 %v1357_v17, %v1356_v15  ;;  %v1262_v24 = vadd.f32 %v1261_v22, %v1020_v21  ;;  %v1263_v26 = vpop.f32.mrb[18].mxu0  ;;  %v1024_v29 = vpop.f32.mrb[19].mxu1 }
 0x2ff   : > { %v1326_v27 = vadd.f32 %v2980_v56, %v1260_v20  ;;  %v1264_v28 = vadd.f32 %v1263_v26, %v1022_v25  ;;  %v1265_v30 = vpop.f32.mrb[19].mxu0 }
 0x300   : > { %1477 = vst [vmem:[%s2917_s27 + $0x38] sm:$0xff] %v1780_v23  ;;  %v1327_v31 = vadd.f32 %v2982_v59, %v1262_v24  ;;  %v1266_v32 = vadd.f32 %v1265_v30, %v1024_v29 }
 0x301   : > { %v1358_v33 = vmax.f32 %v1326_v27, 0.0  ;;  %v1328_v34 = vadd.f32 %v2980_v56, %v1264_v28 }
 0x302   : > { %v1359_v35 = vmax.f32 %v1327_v31, 0.0  ;;  %v1329_v36 = vadd.f32 %v2982_v59, %v1266_v32 }
 0x303   : > { %v1360_v37 = vmax.f32 %v1328_v34, 0.0  ;;  %v1028_v40 = vpop.f32.mrb[20].mxu1 }
 0x304   : > { %v1781_v38 = vpack.c.bf16 %v1359_v35, %v1358_v33  ;;  %v1361_v39 = vmax.f32 %v1329_v36, 0.0  ;;  %v1269_v41 = vpop.f32.mrb[20].mxu0  ;;  %v1030_v43 = vpop.f32.mrb[21].mxu1 }
 0x305   : > { %v1270_v42 = vadd.f32 %v1269_v41, %v1028_v40  ;;  %v1271_v44 = vpop.f32.mrb[21].mxu0  ;;  %v1032_v47 = vpop.f32.mrb[22].mxu1 }
 0x306   : > { %1478 = vst [vmem:[%s2917_s27 + $0x40] sm:$0xff] %v1781_v38  ;;  %v1782_v45 = vpack.c.bf16 %v1361_v39, %v1360_v37  ;;  %v1272_v46 = vadd.f32 %v1271_v44, %v1030_v43  ;;  %v1273_v48 = vpop.f32.mrb[22].mxu0  ;;  %v1034_v52 = vpop.f32.mrb[23].mxu1 }
 0x307   : > { %v1330_v49 = vadd.f32 %v2980_v56, %v1270_v42  ;;  %v1274_v50 = vadd.f32 %v1273_v48, %v1032_v47  ;;  %v1275_v53 = vpop.f32.mrb[23].mxu0 }
 0x308   : > { %1479 = vst [vmem:[%s2917_s27 + $0x48] sm:$0xff] %v1782_v45  ;;  %v1331_v54 = vadd.f32 %v2982_v59, %v1272_v46  ;;  %v1276_v55 = vadd.f32 %v1275_v53, %v1034_v52 }
 0x309   : > { %v1362_v57 = vmax.f32 %v1330_v49, 0.0  ;;  %v1332_v58 = vadd.f32 %v2980_v56, %v1274_v50 }
 0x30a   : > { %v1363_v51 = vmax.f32 %v1331_v54, 0.0  ;;  %v1333_v60 = vadd.f32 %v2982_v59, %v1276_v55 }
 0x30b   : > { %v1364_v61 = vmax.f32 %v1332_v58, 0.0  ;;  %v1038_v0 = vpop.f32.mrb[24].mxu1 }
 0x30c   : > { %v1783_v62 = vpack.c.bf16 %v1363_v51, %v1362_v57  ;;  %v1365_v63 = vmax.f32 %v1333_v60, 0.0  ;;  %v1279_v1 = vpop.f32.mrb[24].mxu0  ;;  %v1040_v3 = vpop.f32.mrb[25].mxu1 }
 0x30d   : > { %v1280_v2 = vadd.f32 %v1279_v1, %v1038_v0  ;;  %v1281_v4 = vpop.f32.mrb[25].mxu0  ;;  %v1042_v7 = vpop.f32.mrb[26].mxu1 }
 0x30e   : > { %1480 = vst [vmem:[%s2917_s27 + $0x50] sm:$0xff] %v1783_v62  ;;  %v1784_v5 = vpack.c.bf16 %v1365_v63, %v1364_v61  ;;  %v1282_v6 = vadd.f32 %v1281_v4, %v1040_v3  ;;  %v1283_v8 = vpop.f32.mrb[26].mxu0  ;;  %v1044_v11 = vpop.f32.mrb[27].mxu1 }
 0x30f   : > { %v1334_v9 = vadd.f32 %v2980_v56, %v1280_v2  ;;  %v1284_v10 = vadd.f32 %v1283_v8, %v1042_v7  ;;  %v1285_v12 = vpop.f32.mrb[27].mxu0 }
 0x310   : > { %1481 = vst [vmem:[%s2917_s27 + $0x58] sm:$0xff] %v1784_v5  ;;  %v1335_v13 = vadd.f32 %v2982_v59, %v1282_v6  ;;  %v1286_v14 = vadd.f32 %v1285_v12, %v1044_v11 }
 0x311   : > { %v1366_v15 = vmax.f32 %v1334_v9, 0.0  ;;  %v1336_v16 = vadd.f32 %v2980_v56, %v1284_v10 }
 0x312   : > { %v1367_v17 = vmax.f32 %v1335_v13, 0.0  ;;  %v1337_v18 = vadd.f32 %v2982_v59, %v1286_v14 }
 0x313   : > { %v1368_v19 = vmax.f32 %v1336_v16, 0.0  ;;  %v1048_v22 = vpop.f32.mrb[28].mxu1 }
 0x314   : > { %v1785_v20 = vpack.c.bf16 %v1367_v17, %v1366_v15  ;;  %v1369_v21 = vmax.f32 %v1337_v18, 0.0  ;;  %v1289_v23 = vpop.f32.mrb[28].mxu0  ;;  %v1050_v25 = vpop.f32.mrb[29].mxu1 }
 0x315   : > { %v1290_v24 = vadd.f32 %v1289_v23, %v1048_v22  ;;  %v1291_v26 = vpop.f32.mrb[29].mxu0  ;;  %v1052_v29 = vpop.f32.mrb[30].mxu1 }
 0x316   : > { %1482 = vst [vmem:[%s2917_s27 + $0x60] sm:$0xff] %v1785_v20  ;;  %v1786_v27 = vpack.c.bf16 %v1369_v21, %v1368_v19  ;;  %v1292_v28 = vadd.f32 %v1291_v26, %v1050_v25  ;;  %v1293_v30 = vpop.f32.mrb[30].mxu0  ;;  %v1054_v33 = vpop.f32.mrb[31].mxu1 }
 0x317   : > { %v1338_v31 = vadd.f32 %v2980_v56, %v1290_v24  ;;  %v1294_v32 = vadd.f32 %v1293_v30, %v1052_v29  ;;  %v1295_v34 = vpop.f32.mrb[31].mxu0 }
 0x318   : > { %1483 = vst [vmem:[%s2917_s27 + $0x68] sm:$0xff] %v1786_v27  ;;  %v1339_v35 = vadd.f32 %v2982_v59, %v1292_v28  ;;  %v1296_v36 = vadd.f32 %v1295_v34, %v1054_v33 }
 0x319   : > { %v1370_v37 = vmax.f32 %v1338_v31, 0.0  ;;  %v1340_v38 = vadd.f32 %v2980_v56, %v1294_v32 }
 0x31a   : > { %v1371_v39 = vmax.f32 %v1339_v35, 0.0  ;;  %v1341_v40 = vadd.f32 %v2982_v59, %v1296_v36 }
 0x31b   : > { %v1372_v41 = vmax.f32 %v1340_v38, 0.0 }
 0x31c   : > { %v1787_v42 = vpack.c.bf16 %v1371_v39, %v1370_v37  ;;  %v1373_v43 = vmax.f32 %v1341_v40, 0.0 }
 0x31e   : > { %1484 = vst [vmem:[%s2917_s27 + $0x70] sm:$0xff] %v1787_v42  ;;  %v1788_v44 = vpack.c.bf16 %v1373_v43, %v1372_v41 }
 0x320   : > { %1485 = vst [vmem:[%s2917_s27 + $0x78] sm:$0xff] %v1788_v44 }
 0x321 PF: > { %s3197_s25 = sld [smem:[#allocation21_spill]]  ;;  %s3198_s12 = sld [smem:[#allocation29_spill]] }
 0x322   : > { %s1501_s18 = sshll.u32 %s2917_s27, 4  ;;  %s1487_s26 = scalar_lea.sflag [#allocation5], %s2903_s14  ;;  %s3039_s18 = int_to_ptr.vmem [resolvable:$true] %s1501_s18 }
 0x323   : > { %s2311_s7 = scalar_lea.vmem %s3039_s18, 2048  ;;  %p3199_p8 = scmp.ne.s32.totalorder %s3181_s1, 0 }
 0x324   : > { %p2312_p13 = scmp.ne.s32.totalorder %s3039_s18, %s2311_s7  ;;  %s2483_s3 = smov [#allocation12]  }
 0x325   : > { %s2315_s11 = sshll.u32 %s2483_s3, 4  ;;  %s2316_s11 = int_to_ptr.vmem [resolvable:$false] %s2315_s11 }
 0x326   : > { %p2313_p7 = pnand %p2312_p13, %p3199_p8  ;;  %s2317_s17 = scalar_lea.vmem %s2316_s11, 4096 }
 0x327   : > { %s1790_s24 = sshll.u32 %s3197_s25, 11  ;;  %p2318_p1 = scmp.lt.s32.totalorder %s3039_s18, %s2316_s11 }
 0x328   : > { %s3036_s30 = scalar_lea.hbm %s3198_s12, %s1790_s24  ;;  %p2314_p3 = pneg %p2313_p7 }
 0x329   : > { %p2319_p9 = scmp.lt.s32.totalorder %s2317_s17, %s2311_s7 }
 0x32b   : > { %p2320_p6 = por %p2319_p9, %p2318_p1 }
 0x32d   : > { %p2321_p4 = pnand %p2320_p6, %p2314_p3 }
 0x32f   : > { %2324 = shalt.err (!%p2321_p4)
}
 0x330   : > { %s2325_s27 = scalar_lea.hbm %s3036_s30, 2048  ;;  %s2329_s25 = scalar_lea.hbm %s3198_s12, 4096 }
 0x331   : > { %p2326_p10 = scmp.ne.s32.totalorder %s3036_s30, %s2325_s27  ;;  %p2330_p0 = scmp.lt.u32.totalorder %s3036_s30, %s3198_s12 }
 0x332   : > { %p2331_p12 = scmp.lt.u32.totalorder %s2329_s25, %s2325_s27  ;;  %p2333_p13 = scmp.lt.u32.totalorder %s2325_s27, %s3036_s30 }
 0x333   : > { %p2327_p11 = pnand %p2326_p10, %p3199_p8 }
 0x334   : > { %p2332_p5 = por %p2331_p12, %p2330_p0 }
 0x335   : > { %p2328_p2 = pneg %p2327_p11 }
 0x336   : > { %p2334_p7 = por %p2333_p13, %p2332_p5 }
 0x338   : > { %p2335_p3 = pnand %p2334_p7, %p2328_p2 }
 0x33a   : > { %2338 = shalt.err (!%p2335_p3)
}
 0x33b   : > { %s2484_s15 = smov 128   ;;  %s2485_s7 = smov 8  }
 0x33c   : > { %1917 = dma.vmem_to_hbm [thread:$0]  (%p3199_p8), %s3039_s18, 2048, %s3036_s30, %s1487_s26, %s2484_s15, %s2484_s15, %s2485_s7  }
 0x33d PF: > { %p1945_p1 = scmp.ge.s32.totalorder %s2469_s10, 2  ;;  %s1516_s3 = sand.u32 1, %s2417_s21  }
 0x33e   : > { %p3200_p9 = scmp.ne.s32.totalorder %s3182_s19, 0  ;;  %s1517_s11 = scalar_lea.sflag [#allocation5], %s1516_s3 }
 0x340   : > { %p1937_p6 = pnand %p1945_p1, %p3200_p9 }
 0x342   : > { %2412 = dma.done.wait (!%p1937_p6), %s1517_s11, 2048  }
 0x343   : > { %2414 = vsyncadd (!%p1937_p6), %s1517_s11, 4294965248  ;;  %s26_s10 = sadd.s32 1, %s2469_s10   ;;  %s3202_s24 = sld [smem:[#allocation18_spill]] }
 0x344   : > { %p3070_p4 = scmp.ge.s32.totalorder %s26_s10, 6   ;;  %s3203_s25 = sld [smem:[#allocation19_spill]] }
 0x345   : > { %s3204_s26 = sld [smem:[#allocation24_spill]]  ;;  %s3205_s1 = sld [smem:[#allocation22_spill]] }
 0x346   : > { %s3206_s19 = sld [smem:[#allocation23_spill]]  ;;  %s3207_s21 = smov %s2421_s22 }
 0x347   : > { %s3208_s22 = smov %s2425_s23  ;;  %s3209_s23 = smov %s2817_s5 }
 0x348   : > { %s3210_s27 = smov %s2445_s28  ;;  %s3211_s28 = smov %s2449_s29 }
 0x349   : > { %s3212_s29 = smov %s2752_s16  ;;  %s3213_s30 = smov %s2461_s8 }
 0x34a   : > { %s3214_s7 = smov %s2465_s9  ;;  %25 = sbr.rel (!%p3070_p4) target bundleno = 18 (0x12), region = 129 }
 0x34b   : > { %s3215_s8 = smov %s3205_s1 }
 0x34c   : > { %s3216_s9 = smov %s3206_s19 }
 0x351   :  { %1522 = vsyncpa [#allocation4], 1 }
 0x352   :  { %1524 = vsyncpa [#allocation4 + $0x1], 1 }
 0x353   :  { %1525 = vsyncpa [#allocation7], 1 }
 0x354   :  { %1527 = vsyncpa [#allocation7 + $0x1], 1 }
 0x355   :  { %1528 = vsyncpa [#allocation10], 1 }
 0x356   :  { %1529 = vsyncpa [#allocation5], 1 }
 0x357   :  { %1531 = vsyncpa [#allocation5 + $0x1], 1 }

</bundles_post_ra>
